<compile_context>
chip_gen: v7x
topology: tpu7x:2x2x1
jax: 0.10.0
libtpu: 0.0.40
codegen_flags: <defaults>
</compile_context>

<pallas_src>
import jax
import jax.numpy as jnp
from jax.experimental import pallas as pl
from jax.experimental.pallas import tpu as pltpu

BN_EPS = 1e-5
FUSE_K_MAX = 256          # fold taps into one dot when 9*Cin <= this


def _vmem_budget_bytes():
    """Generation-aware VMEM budget (v5e/v6e: 128 MiB physical, v7x: 64 MiB)."""
    cap = 64 * 1024 * 1024                      # conservative fallback (v7x-sized)
    try:
        cap = int(pltpu.get_tpu_info().vmem_capacity_bytes)
    except Exception:
        pass
    return min(int(cap * 3 // 4), 100 * 1024 * 1024)


def _pick_row_tile(hp, wp, w_pad, cin, cout_pad, l_in, mxu_bytes, y_bytes,
                   budget, fuse, max_th=32):
    """Largest divisor `th` of hp (capped to bound loop unrolling) whose phase-1
    working set fits the VMEM budget.  th=1 is the explicit fallback (the
    whole-image input block is the irreducible term)."""
    def need(th):
        tile_rows = th * w_pad
        win_rows = tile_rows + 2 * w_pad + 2
        return (2 * l_in * cin * 4                          # x block (f32, 2 buffers)
                + 2 * 9 * cin * cout_pad * mxu_bytes        # weights (2 buffers)
                + 2 * th * wp * cout_pad * y_bytes          # y tile (2 buffers)
                + 8 * cout_pad * 4                          # s1/s2 tiles
                + win_rows * cin * mxu_bytes                # window scratch
                + (tile_rows * 9 * cin * mxu_bytes if fuse else 0)   # im2col scratch
                + 2 * tile_rows * cout_pad * 4)             # acc + live-value headroom
    best = 1
    for th in range(1, min(hp, max_th) + 1):
        if hp % th == 0 and need(th) <= budget:
            best = th
    return best


def _pick_spatial_tile(hw, cout_pad, y_bytes, budget):
    """Phase-2 spatial tile: whole image if it fits, else the largest multiple-of-128
    divisor of H'*W' that fits (keeps both in/out blocks lane/tile legal)."""
    def need(t):
        return t * cout_pad * (2 * y_bytes + 2 * 4) + 4 * cout_pad * 4
    if need(hw) <= budget:
        return hw
    best = None
    for cand in range(128, hw, 128):
        if hw % cand == 0 and need(cand) <= budget:
            best = cand
    return best if best is not None else hw


def skip_block_forward(x_nchw, w_conv, gamma, beta, scale_factor=2,
                       mxu_dtype=jnp.float32):
    """x_nchw: (N, Cin, H, W) f32; w_conv: (Cout, Cin, 3, 3) PyTorch OIHW. Returns NCHW."""
    n, cin, h, w = x_nchw.shape
    cout = w_conv.shape[0]
    cout_pad = ((cout + 127) // 128) * 128          # lane-dense output channels
    mxu_dtype = jnp.dtype(mxu_dtype)
    mxu_bytes = mxu_dtype.itemsize
    y_dtype = mxu_dtype                             # intermediate follows the MXU dtype
    y_bytes = jnp.dtype(y_dtype).itemsize

    # ---- glue: NCHW -> NHWC, avg-pool via reshape+mean --------------------------------
    x = jnp.transpose(x_nchw, (0, 2, 3, 1)).astype(jnp.float32)
    if scale_factor >= 2:
        s = int(scale_factor)
        hp, wp = h // s, w // s
        x = x[:, :hp * s, :wp * s, :].reshape(n, hp, s, wp, s, cin).mean(axis=(2, 4))
    else:
        hp, wp = h, w

    h_pad, w_pad = hp + 2, wp + 2                   # conv padding = 1
    l_in = h_pad * w_pad + 2                        # flattened padded image + 2 guard rows

    # flattened padded raster per image (kept f32 in HBM: dynamic row-offset slicing of
    # 32-bit data is robust; the one in-kernel cast per tile produces the MXU operands)
    xp = jnp.pad(x, ((0, 0), (1, 1), (1, 1), (0, 0)))
    xf = xp.reshape(n, h_pad * w_pad, cin)
    guard = jnp.zeros((n, 1, cin), jnp.float32)
    xf = jnp.concatenate([guard, xf, guard], axis=1)            # (N, l_in, Cin)

    # weights OIHW -> (ky,kx,cin,cout_pad); fused path flattens to (9*cin, cout_pad)
    fuse = (9 * cin) <= FUSE_K_MAX
    w_hwio = jnp.transpose(w_conv.astype(jnp.float32), (2, 3, 1, 0))
    w_hwio = jnp.pad(w_hwio, ((0, 0), (0, 0), (0, 0), (0, cout_pad - cout)))
    if fuse:
        w_mat = w_hwio.reshape(9 * cin, cout_pad).astype(mxu_dtype)
        w_spec = pl.BlockSpec((9 * cin, cout_pad), lambda b, j: (0, 0))
    else:
        w_mat = w_hwio.reshape(9, cin, cout_pad).astype(mxu_dtype)
        w_spec = pl.BlockSpec((9, cin, cout_pad), lambda b, j: (0, 0, 0))

    budget = _vmem_budget_bytes()
    th = _pick_row_tile(hp, wp, w_pad, cin, cout_pad, l_in, mxu_bytes, y_bytes,
                        budget, fuse)
    ht = hp // th
    tile_rows = th * w_pad
    win_rows = tile_rows + 2 * w_pad + 2

    # ---- phase 1: conv (one K=9*Cin MXU dot per tile) + per-tile BN partial sums ------
    def conv_stats_kernel(x_ref, w_ref, y_ref, s1_ref, s2_ref, *scratch):
        win_ref = scratch[0]
        j = pl.program_id(1)
        base = j * tile_rows
        if tile_rows % 8 == 0:
            base = pl.multiple_of(base, 8)
        # one dynamic f32 window load + ONE cast per tile; taps below slice the
        # already-cast VMEM window at static offsets
        win_ref[...] = x_ref[pl.ds(base, win_rows), :].astype(mxu_dtype)
        if fuse:
            col_ref = scratch[1]                    # in-VMEM im2col of this tile only
            for k in range(9):
                ky, kx = divmod(k, 3)
                off = ky * w_pad + kx
                col_ref[:, k * cin:(k + 1) * cin] = win_ref[off:off + tile_rows, :]
            acc = jnp.dot(col_ref[...], w_ref[...],
                          preferred_element_type=jnp.float32)
        else:
            acc = jnp.zeros((tile_rows, cout_pad), jnp.float32)
            for k in range(9):
                ky, kx = divmod(k, 3)
                off = ky * w_pad + kx
                acc = acc + jnp.dot(win_ref[off:off + tile_rows, :], w_ref[k],
                                    preferred_element_type=jnp.float32)
        # drop W-halo columns before storing; BN partial sums (f32) from valid pixels.
        # NOTE: global mean/var come from summing these partials host-side (train-mode
        # batch statistics, never per-tile stats); E[x^2]-mean^2 in f32 is adequate for
        # conv outputs (|mean| ~ std); clamped host-side for safety.
        s1 = jnp.zeros((1, cout_pad), jnp.float32)
        s2 = jnp.zeros((1, cout_pad), jnp.float32)
        for oy in range(th):
            row = acc[oy * w_pad + 1: oy * w_pad + 1 + wp, :]
            y_ref[oy] = row.astype(y_ref.dtype)
            s1 = s1 + jnp.sum(row, axis=0, keepdims=True)
            s2 = s2 + jnp.sum(row * row, axis=0, keepdims=True)
        s1_ref[...] = s1
        s2_ref[...] = s2

    scratch_shapes = [pltpu.VMEM((win_rows, cin), mxu_dtype)]
    if fuse:
        scratch_shapes.append(pltpu.VMEM((tile_rows, 9 * cin), mxu_dtype))

    flops1 = 2 * n * hp * w_pad * 9 * cin * cout_pad
    bytes1 = (n * l_in * cin * 4 + w_mat.size * mxu_bytes
              + n * hp * wp * cout_pad * y_bytes + 2 * n * ht * cout_pad * 4)
    y_out, s1_out, s2_out = pl.pallas_call(
        conv_stats_kernel,
        out_shape=(jax.ShapeDtypeStruct((n, hp, wp, cout_pad), y_dtype),
                   jax.ShapeDtypeStruct((n, ht, 1, cout_pad), jnp.float32),
                   jax.ShapeDtypeStruct((n, ht, 1, cout_pad), jnp.float32)),
        grid_spec=pltpu.PrefetchScalarGridSpec(
            num_scalar_prefetch=0,
            grid=(n, ht),
            in_specs=[
                pl.BlockSpec((None, l_in, cin), lambda b, j: (b, 0, 0)),
                w_spec,
            ],
            out_specs=[
                pl.BlockSpec((None, th, wp, cout_pad), lambda b, j: (b, j, 0, 0)),
                pl.BlockSpec((None, None, 1, cout_pad), lambda b, j: (b, j, 0, 0)),
                pl.BlockSpec((None, None, 1, cout_pad), lambda b, j: (b, j, 0, 0)),
            ],
            scratch_shapes=scratch_shapes),
        compiler_params=pltpu.CompilerParams(
            dimension_semantics=("parallel", "parallel"),
            vmem_limit_bytes=budget),
        cost_estimate=pl.CostEstimate(flops=flops1, transcendentals=0,
                                      bytes_accessed=bytes1),
    )(xf, w_mat)

    # ---- global train-mode BN stats -> per-channel scale/shift (tiny, computed once) --
    cnt = jnp.float32(n * hp * wp)
    s1 = s1_out.reshape(-1, cout_pad).sum(axis=0)
    s2 = s2_out.reshape(-1, cout_pad).sum(axis=0)
    mean = s1 / cnt
    var = jnp.maximum(s2 / cnt - mean * mean, 0.0)
    gamma_p = jnp.pad(gamma.astype(jnp.float32), (0, cout_pad - cout))
    beta_p = jnp.pad(beta.astype(jnp.float32), (0, cout_pad - cout))
    inv = jax.lax.rsqrt(var + BN_EPS)
    scale = (gamma_p * inv).reshape(1, cout_pad)
    shift = (beta_p - mean * gamma_p * inv).reshape(1, cout_pad)

    # ---- phase 2: fused y*scale + shift, ReLU, and NHWC->NCHW transpose ----------------
    hw = hp * wp
    tm_r = _pick_spatial_tile(hw, cout_pad, y_bytes, budget)
    y2 = y_out.reshape(n, hw, cout_pad)             # metadata-only reshape

    def bn_relu_t_kernel(y_ref, scale_ref, shift_ref, o_ref):
        yv = y_ref[...].astype(jnp.float32)
        z = jnp.maximum(yv * scale_ref[...] + shift_ref[...], 0.0)
        o_ref[...] = jnp.transpose(z, (1, 0))       # XLU transpose; phase 2 is HBM-bound

    flops2 = 3 * n * hw * cout_pad
    bytes2 = n * hw * cout_pad * (y_bytes + 4) + 2 * cout_pad * 4
    out_t = pl.pallas_call(
        bn_relu_t_kernel,
        out_shape=jax.ShapeDtypeStruct((n, cout_pad, hw), jnp.float32),
        grid_spec=pltpu.PrefetchScalarGridSpec(
            num_scalar_prefetch=0,
            grid=(n, hw // tm_r),
            in_specs=[
                pl.BlockSpec((None, tm_r, cout_pad), lambda b, i: (b, i, 0)),
                pl.BlockSpec((1, cout_pad), lambda b, i: (0, 0)),
                pl.BlockSpec((1, cout_pad), lambda b, i: (0, 0)),
            ],
            out_specs=pl.BlockSpec((None, cout_pad, tm_r), lambda b, i: (b, 0, i))),
        compiler_params=pltpu.CompilerParams(
            dimension_semantics=("parallel", "parallel"),
            vmem_limit_bytes=budget),
        cost_estimate=pl.CostEstimate(flops=flops2, transcendentals=0,
                                      bytes_accessed=bytes2),
    )(y2, scale, shift)

    # compact channel slice + metadata reshape (no full transpose pass in XLA)
    return out_t[:, :cout, :].reshape(n, cout, hp, wp)


def reference_forward(x_nchw, w_conv, gamma, beta, scale_factor=2):
    """Pure-JAX reference mirroring the PyTorch forward (train-mode BN)."""
    x = x_nchw
    if scale_factor >= 2:
        s = scale_factor
        n, c, h, w = x.shape
        x = x[:, :, :(h // s) * s, :(w // s) * s]
        x = x.reshape(n, c, h // s, s, w // s, s).mean(axis=(3, 5))
    y = jax.lax.conv_general_dilated(
        x, w_conv, window_strides=(1, 1), padding=((1, 1), (1, 1)),
        dimension_numbers=("NCHW", "OIHW", "NCHW"))
    mean = y.mean(axis=(0, 2, 3), keepdims=True)
    var = ((y - mean) ** 2).mean(axis=(0, 2, 3), keepdims=True)
    y = (y - mean) / jnp.sqrt(var + BN_EPS)
    y = y * gamma.reshape(1, -1, 1, 1) + beta.reshape(1, -1, 1, 1)
    return jnp.maximum(y, 0.0)


if __name__ == "__main__":
    N, Cin, H, W = 2, 4, 16, 16
    Cout = 8
    scale_factor = 2

    key = jax.random.PRNGKey(0)
    k_x, k_w, k_g, k_b = jax.random.split(key, 4)
    x = jax.random.normal(k_x, (N, Cin, H, W), dtype=jnp.float32)
    # Deterministic synthetic parameters (shapes per nn.Conv2d / nn.BatchNorm2d)
    w_conv = 0.1 * jax.random.normal(k_w, (Cout, Cin, 3, 3), dtype=jnp.float32)
    gamma = 1.0 + 0.1 * jax.random.normal(k_g, (Cout,), dtype=jnp.float32)
    beta = 0.1 * jax.random.normal(k_b, (Cout,), dtype=jnp.float32)

    ref = reference_forward(x, w_conv, gamma, beta, scale_factor)

    # f32 MXU operands / f32 intermediate: tight check against the pure-JAX reference.
    out = skip_block_forward(x, w_conv, gamma, beta, scale_factor,
                             mxu_dtype=jnp.float32)
    out = jax.block_until_ready(out)
    assert out.shape == (N, Cout, H // scale_factor, W // scale_factor)
    assert jnp.allclose(out, ref, atol=1e-3, rtol=1e-3), \
        float(jnp.max(jnp.abs(out - ref)))

    # bf16 MXU operands + bf16 intermediate (v6e/v7x fast path); BN stats stay f32.
    # NOTE: statistics are derived from the bf16-operand conv output (internally
    # consistent but looser vs. the f32 reference).
    out_bf16 = skip_block_forward(x, w_conv, gamma, beta, scale_factor,
                                  mxu_dtype=jnp.bfloat16)
    out_bf16 = jax.block_until_ready(out_bf16)
    assert jnp.allclose(out_bf16, ref, atol=5e-2, rtol=5e-2), \
        float(jnp.max(jnp.abs(out_bf16 - ref)))

    print("KERNEL_OK")
</pallas_src>

<mosaic_0001>
module attributes {stable_mosaic.version = 11 : i64} {
  func.func @conv_stats_kernel(%arg0: i32, %arg1: i32, %arg2: memref<1x102x4xf32, #tpu.memory_space<vmem>>, %arg3: memref<36x128xf32, #tpu.memory_space<vmem>>, %arg4: memref<1x8x8x128xf32, #tpu.memory_space<vmem>>, %arg5: memref<1x1x1x128xf32, #tpu.memory_space<vmem>>, %arg6: memref<1x1x1x128xf32, #tpu.memory_space<vmem>>, %arg7: memref<102x4xf32, #tpu.memory_space<vmem>>, %arg8: memref<80x36xf32, #tpu.memory_space<vmem>>) attributes {dimension_semantics = [#tpu.dimension_semantics<parallel>, #tpu.dimension_semantics<parallel>], iteration_bounds = array<i64: 2, 1>, scalar_prefetch = 0 : i64, scratch_operands = 2 : i64, tpu.core_type = #tpu.core_type<tc>, window_params = [{transform_indices = @transform_0, window_bounds = array<i64: 1, 102, 4>}, {pipeline_mode = #tpu.pipeline_mode<synchronous>, transform_indices = @transform_1, window_bounds = array<i64: 36, 128>}, {transform_indices = @transform_2, window_bounds = array<i64: 1, 8, 8, 128>}, {transform_indices = @transform_3, window_bounds = array<i64: 1, 1, 1, 128>}, {transform_indices = @transform_4, window_bounds = array<i64: 1, 1, 1, 128>}]} {
    %c80_i32 = arith.constant 80 : i32
    %0 = arith.muli %arg1, %c80_i32 : i32
    %1 = tpu.assume_multiple %0, 8 : i32
    %c0 = arith.constant 0 : index
    %2 = arith.index_cast %1 : i32 to index
    %c0_0 = arith.constant 0 : index
    %3 = vector.load %arg2[%c0, %2, %c0_0] : memref<1x102x4xf32, #tpu.memory_space<vmem>>, vector<1x102x4xf32>
    %4 = vector.shape_cast %3 : vector<1x102x4xf32> to vector<102x4xf32>
    %c0_1 = arith.constant 0 : index
    %c0_2 = arith.constant 0 : index
    %5 = vector.load %arg7[%c0_1, %c0_2] : memref<102x4xf32, #tpu.memory_space<vmem>>, vector<102x4xf32>
    tpu.vector_store %arg7[%c0_1, %c0_2], %4 {strides = array<i32>} : memref<102x4xf32, #tpu.memory_space<vmem>>, vector<102x4xf32>,
    %c0_3 = arith.constant 0 : index
    %c0_4 = arith.constant 0 : index
    %6 = vector.load %arg7[%c0_3, %c0_4] : memref<102x4xf32, #tpu.memory_space<vmem>>, vector<80x4xf32>
    %c0_5 = arith.constant 0 : index
    %c0_6 = arith.constant 0 : index
    %7 = vector.load %arg8[%c0_5, %c0_6] : memref<80x36xf32, #tpu.memory_space<vmem>>, vector<80x4xf32>
    tpu.vector_store %arg8[%c0_5, %c0_6], %6 {strides = array<i32>} : memref<80x36xf32, #tpu.memory_space<vmem>>, vector<80x4xf32>,
    %c1 = arith.constant 1 : index
    %c0_7 = arith.constant 0 : index
    %8 = vector.load %arg7[%c1, %c0_7] : memref<102x4xf32, #tpu.memory_space<vmem>>, vector<80x4xf32>
    %c0_8 = arith.constant 0 : index
    %c4 = arith.constant 4 : index
    %9 = vector.load %arg8[%c0_8, %c4] : memref<80x36xf32, #tpu.memory_space<vmem>>, vector<80x4xf32>
    tpu.vector_store %arg8[%c0_8, %c4], %8 {strides = array<i32>} : memref<80x36xf32, #tpu.memory_space<vmem>>, vector<80x4xf32>,
    %c2 = arith.constant 2 : index
    %c0_9 = arith.constant 0 : index
    %10 = vector.load %arg7[%c2, %c0_9] : memref<102x4xf32, #tpu.memory_space<vmem>>, vector<80x4xf32>
    %c0_10 = arith.constant 0 : index
    %c8 = arith.constant 8 : index
    %11 = vector.load %arg8[%c0_10, %c8] : memref<80x36xf32, #tpu.memory_space<vmem>>, vector<80x4xf32>
    tpu.vector_store %arg8[%c0_10, %c8], %10 {strides = array<i32>} : memref<80x36xf32, #tpu.memory_space<vmem>>, vector<80x4xf32>,
    %c10 = arith.constant 10 : index
    %c0_11 = arith.constant 0 : index
    %12 = vector.load %arg7[%c10, %c0_11] : memref<102x4xf32, #tpu.memory_space<vmem>>, vector<80x4xf32>
    %c0_12 = arith.constant 0 : index
    %c12 = arith.constant 12 : index
    %13 = vector.load %arg8[%c0_12, %c12] : memref<80x36xf32, #tpu.memory_space<vmem>>, vector<80x4xf32>
    tpu.vector_store %arg8[%c0_12, %c12], %12 {strides = array<i32>} : memref<80x36xf32, #tpu.memory_space<vmem>>, vector<80x4xf32>,
    %c11 = arith.constant 11 : index
    %c0_13 = arith.constant 0 : index
    %14 = vector.load %arg7[%c11, %c0_13] : memref<102x4xf32, #tpu.memory_space<vmem>>, vector<80x4xf32>
    %c0_14 = arith.constant 0 : index
    %c16 = arith.constant 16 : index
    %15 = vector.load %arg8[%c0_14, %c16] : memref<80x36xf32, #tpu.memory_space<vmem>>, vector<80x4xf32>
    tpu.vector_store %arg8[%c0_14, %c16], %14 {strides = array<i32>} : memref<80x36xf32, #tpu.memory_space<vmem>>, vector<80x4xf32>,
    %c12_15 = arith.constant 12 : index
    %c0_16 = arith.constant 0 : index
    %16 = vector.load %arg7[%c12_15, %c0_16] : memref<102x4xf32, #tpu.memory_space<vmem>>, vector<80x4xf32>
    %c0_17 = arith.constant 0 : index
    %c20 = arith.constant 20 : index
    %17 = vector.load %arg8[%c0_17, %c20] : memref<80x36xf32, #tpu.memory_space<vmem>>, vector<80x4xf32>
    tpu.vector_store %arg8[%c0_17, %c20], %16 {strides = array<i32>} : memref<80x36xf32, #tpu.memory_space<vmem>>, vector<80x4xf32>,
    %c20_18 = arith.constant 20 : index
    %c0_19 = arith.constant 0 : index
    %18 = vector.load %arg7[%c20_18, %c0_19] : memref<102x4xf32, #tpu.memory_space<vmem>>, vector<80x4xf32>
    %c0_20 = arith.constant 0 : index
    %c24 = arith.constant 24 : index
    %19 = vector.load %arg8[%c0_20, %c24] : memref<80x36xf32, #tpu.memory_space<vmem>>, vector<80x4xf32>
    tpu.vector_store %arg8[%c0_20, %c24], %18 {strides = array<i32>} : memref<80x36xf32, #tpu.memory_space<vmem>>, vector<80x4xf32>,
    %c21 = arith.constant 21 : index
    %c0_21 = arith.constant 0 : index
    %20 = vector.load %arg7[%c21, %c0_21] : memref<102x4xf32, #tpu.memory_space<vmem>>, vector<80x4xf32>
    %c0_22 = arith.constant 0 : index
    %c28 = arith.constant 28 : index
    %21 = vector.load %arg8[%c0_22, %c28] : memref<80x36xf32, #tpu.memory_space<vmem>>, vector<80x4xf32>
    tpu.vector_store %arg8[%c0_22, %c28], %20 {strides = array<i32>} : memref<80x36xf32, #tpu.memory_space<vmem>>, vector<80x4xf32>,
    %c22 = arith.constant 22 : index
    %c0_23 = arith.constant 0 : index
    %22 = vector.load %arg7[%c22, %c0_23] : memref<102x4xf32, #tpu.memory_space<vmem>>, vector<80x4xf32>
    %c0_24 = arith.constant 0 : index
    %c32 = arith.constant 32 : index
    %23 = vector.load %arg8[%c0_24, %c32] : memref<80x36xf32, #tpu.memory_space<vmem>>, vector<80x4xf32>
    tpu.vector_store %arg8[%c0_24, %c32], %22 {strides = array<i32>} : memref<80x36xf32, #tpu.memory_space<vmem>>, vector<80x4xf32>,
    %c0_25 = arith.constant 0 : index
    %c0_26 = arith.constant 0 : index
    %24 = vector.load %arg8[%c0_25, %c0_26] : memref<80x36xf32, #tpu.memory_space<vmem>>, vector<80x36xf32>
    %c0_27 = arith.constant 0 : index
    %c0_28 = arith.constant 0 : index
    %25 = vector.load %arg3[%c0_27, %c0_28] : memref<36x128xf32, #tpu.memory_space<vmem>>, vector<36x128xf32>
    %cst = arith.constant dense<0.000000e+00> : vector<80x128xf32>
    %26 = tpu.matmul %24, %25, %cst {dimension_numbers = #tpu.dot_dimension_numbers<[1], [0], [0], [1], [0, 0, 1, 1], [], []>} : vector<80x36xf32>, vector<36x128xf32>, vector<80x128xf32> -> vector<80x128xf32>
    %cst_29 = arith.constant 0.000000e+00 : f32
    %27 = vector.broadcast %cst_29 : f32 to vector<1x128xf32>
    %cst_30 = arith.constant 0.000000e+00 : f32
    %28 = vector.broadcast %cst_30 : f32 to vector<1x128xf32>
    %29 = vector.extract_strided_slice %26 {offsets = [1, 0], sizes = [8, 128], strides = [1, 1]} : vector<80x128xf32> to vector<8x128xf32>
    %c0_31 = arith.constant 0 : index
    %c0_32 = arith.constant 0 : index
    %c0_33 = arith.constant 0 : index
    %c0_34 = arith.constant 0 : index
    %30 = vector.load %arg4[%c0_31, %c0_32, %c0_33, %c0_34] : memref<1x8x8x128xf32, #tpu.memory_space<vmem>>, vector<1x1x8x128xf32>
    %31 = vector.shape_cast %30 : vector<1x1x8x128xf32> to vector<8x128xf32>
    %32 = vector.shape_cast %29 : vector<8x128xf32> to vector<1x1x8x128xf32>
    tpu.vector_store %arg4[%c0_31, %c0_32, %c0_33, %c0_34], %32 {strides = array<i32>} : memref<1x8x8x128xf32, #tpu.memory_space<vmem>>, vector<1x1x8x128xf32>,
    %cst_35 = arith.constant dense<0.000000e+00> : vector<128xf32>
    %33 = vector.multi_reduction <add>, %29, %cst_35 [0] : vector<8x128xf32> to vector<128xf32>
    %34 = vector.shape_cast %33 : vector<128xf32> to vector<1x128xf32>
    %35 = arith.addf %27, %34 : vector<1x128xf32>
    %36 = arith.mulf %29, %29 : vector<8x128xf32>
    %cst_36 = arith.constant dense<0.000000e+00> : vector<128xf32>
    %37 = vector.multi_reduction <add>, %36, %cst_36 [0] : vector<8x128xf32> to vector<128xf32>
    %38 = vector.shape_cast %37 : vector<128xf32> to vector<1x128xf32>
    %39 = arith.addf %28, %38 : vector<1x128xf32>
    %40 = vector.extract_strided_slice %26 {offsets = [11, 0], sizes = [8, 128], strides = [1, 1]} : vector<80x128xf32> to vector<8x128xf32>
    %c0_37 = arith.constant 0 : index
    %c1_38 = arith.constant 1 : index
    %c0_39 = arith.constant 0 : index
    %c0_40 = arith.constant 0 : index
    %41 = vector.load %arg4[%c0_37, %c1_38, %c0_39, %c0_40] : memref<1x8x8x128xf32, #tpu.memory_space<vmem>>, vector<1x1x8x128xf32>
    %42 = vector.shape_cast %41 : vector<1x1x8x128xf32> to vector<8x128xf32>
    %43 = vector.shape_cast %40 : vector<8x128xf32> to vector<1x1x8x128xf32>
    tpu.vector_store %arg4[%c0_37, %c1_38, %c0_39, %c0_40], %43 {strides = array<i32>} : memref<1x8x8x128xf32, #tpu.memory_space<vmem>>, vector<1x1x8x128xf32>,
    %cst_41 = arith.constant dense<0.000000e+00> : vector<128xf32>
    %44 = vector.multi_reduction <add>, %40, %cst_41 [0] : vector<8x128xf32> to vector<128xf32>
    %45 = vector.shape_cast %44 : vector<128xf32> to vector<1x128xf32>
    %46 = arith.addf %35, %45 : vector<1x128xf32>
    %47 = arith.mulf %40, %40 : vector<8x128xf32>
    %cst_42 = arith.constant dense<0.000000e+00> : vector<128xf32>
    %48 = vector.multi_reduction <add>, %47, %cst_42 [0] : vector<8x128xf32> to vector<128xf32>
    %49 = vector.shape_cast %48 : vector<128xf32> to vector<1x128xf32>
    %50 = arith.addf %39, %49 : vector<1x128xf32>
    %51 = vector.extract_strided_slice %26 {offsets = [21, 0], sizes = [8, 128], strides = [1, 1]} : vector<80x128xf32> to vector<8x128xf32>
    %c0_43 = arith.constant 0 : index
    %c2_44 = arith.constant 2 : index
    %c0_45 = arith.constant 0 : index
    %c0_46 = arith.constant 0 : index
    %52 = vector.load %arg4[%c0_43, %c2_44, %c0_45, %c0_46] : memref<1x8x8x128xf32, #tpu.memory_space<vmem>>, vector<1x1x8x128xf32>
    %53 = vector.shape_cast %52 : vector<1x1x8x128xf32> to vector<8x128xf32>
    %54 = vector.shape_cast %51 : vector<8x128xf32> to vector<1x1x8x128xf32>
    tpu.vector_store %arg4[%c0_43, %c2_44, %c0_45, %c0_46], %54 {strides = array<i32>} : memref<1x8x8x128xf32, #tpu.memory_space<vmem>>, vector<1x1x8x128xf32>,
    %cst_47 = arith.constant dense<0.000000e+00> : vector<128xf32>
    %55 = vector.multi_reduction <add>, %51, %cst_47 [0] : vector<8x128xf32> to vector<128xf32>
    %56 = vector.shape_cast %55 : vector<128xf32> to vector<1x128xf32>
    %57 = arith.addf %46, %56 : vector<1x128xf32>
    %58 = arith.mulf %51, %51 : vector<8x128xf32>
    %cst_48 = arith.constant dense<0.000000e+00> : vector<128xf32>
    %59 = vector.multi_reduction <add>, %58, %cst_48 [0] : vector<8x128xf32> to vector<128xf32>
    %60 = vector.shape_cast %59 : vector<128xf32> to vector<1x128xf32>
    %61 = arith.addf %50, %60 : vector<1x128xf32>
    %62 = vector.extract_strided_slice %26 {offsets = [31, 0], sizes = [8, 128], strides = [1, 1]} : vector<80x128xf32> to vector<8x128xf32>
    %c0_49 = arith.constant 0 : index
    %c3 = arith.constant 3 : index
    %c0_50 = arith.constant 0 : index
    %c0_51 = arith.constant 0 : index
    %63 = vector.load %arg4[%c0_49, %c3, %c0_50, %c0_51] : memref<1x8x8x128xf32, #tpu.memory_space<vmem>>, vector<1x1x8x128xf32>
    %64 = vector.shape_cast %63 : vector<1x1x8x128xf32> to vector<8x128xf32>
    %65 = vector.shape_cast %62 : vector<8x128xf32> to vector<1x1x8x128xf32>
    tpu.vector_store %arg4[%c0_49, %c3, %c0_50, %c0_51], %65 {strides = array<i32>} : memref<1x8x8x128xf32, #tpu.memory_space<vmem>>, vector<1x1x8x128xf32>,
    %cst_52 = arith.constant dense<0.000000e+00> : vector<128xf32>
    %66 = vector.multi_reduction <add>, %62, %cst_52 [0] : vector<8x128xf32> to vector<128xf32>
    %67 = vector.shape_cast %66 : vector<128xf32> to vector<1x128xf32>
    %68 = arith.addf %57, %67 : vector<1x128xf32>
    %69 = arith.mulf %62, %62 : vector<8x128xf32>
    %cst_53 = arith.constant dense<0.000000e+00> : vector<128xf32>
    %70 = vector.multi_reduction <add>, %69, %cst_53 [0] : vector<8x128xf32> to vector<128xf32>
    %71 = vector.shape_cast %70 : vector<128xf32> to vector<1x128xf32>
    %72 = arith.addf %61, %71 : vector<1x128xf32>
    %73 = vector.extract_strided_slice %26 {offsets = [41, 0], sizes = [8, 128], strides = [1, 1]} : vector<80x128xf32> to vector<8x128xf32>
    %c0_54 = arith.constant 0 : index
    %c4_55 = arith.constant 4 : index
    %c0_56 = arith.constant 0 : index
    %c0_57 = arith.constant 0 : index
    %74 = vector.load %arg4[%c0_54, %c4_55, %c0_56, %c0_57] : memref<1x8x8x128xf32, #tpu.memory_space<vmem>>, vector<1x1x8x128xf32>
    %75 = vector.shape_cast %74 : vector<1x1x8x128xf32> to vector<8x128xf32>
    %76 = vector.shape_cast %73 : vector<8x128xf32> to vector<1x1x8x128xf32>
    tpu.vector_store %arg4[%c0_54, %c4_55, %c0_56, %c0_57], %76 {strides = array<i32>} : memref<1x8x8x128xf32, #tpu.memory_space<vmem>>, vector<1x1x8x128xf32>,
    %cst_58 = arith.constant dense<0.000000e+00> : vector<128xf32>
    %77 = vector.multi_reduction <add>, %73, %cst_58 [0] : vector<8x128xf32> to vector<128xf32>
    %78 = vector.shape_cast %77 : vector<128xf32> to vector<1x128xf32>
    %79 = arith.addf %68, %78 : vector<1x128xf32>
    %80 = arith.mulf %73, %73 : vector<8x128xf32>
    %cst_59 = arith.constant dense<0.000000e+00> : vector<128xf32>
    %81 = vector.multi_reduction <add>, %80, %cst_59 [0] : vector<8x128xf32> to vector<128xf32>
    %82 = vector.shape_cast %81 : vector<128xf32> to vector<1x128xf32>
    %83 = arith.addf %72, %82 : vector<1x128xf32>
    %84 = vector.extract_strided_slice %26 {offsets = [51, 0], sizes = [8, 128], strides = [1, 1]} : vector<80x128xf32> to vector<8x128xf32>
    %c0_60 = arith.constant 0 : index
    %c5 = arith.constant 5 : index
    %c0_61 = arith.constant 0 : index
    %c0_62 = arith.constant 0 : index
    %85 = vector.load %arg4[%c0_60, %c5, %c0_61, %c0_62] : memref<1x8x8x128xf32, #tpu.memory_space<vmem>>, vector<1x1x8x128xf32>
    %86 = vector.shape_cast %85 : vector<1x1x8x128xf32> to vector<8x128xf32>
    %87 = vector.shape_cast %84 : vector<8x128xf32> to vector<1x1x8x128xf32>
    tpu.vector_store %arg4[%c0_60, %c5, %c0_61, %c0_62], %87 {strides = array<i32>} : memref<1x8x8x128xf32, #tpu.memory_space<vmem>>, vector<1x1x8x128xf32>,
    %cst_63 = arith.constant dense<0.000000e+00> : vector<128xf32>
    %88 = vector.multi_reduction <add>, %84, %cst_63 [0] : vector<8x128xf32> to vector<128xf32>
    %89 = vector.shape_cast %88 : vector<128xf32> to vector<1x128xf32>
    %90 = arith.addf %79, %89 : vector<1x128xf32>
    %91 = arith.mulf %84, %84 : vector<8x128xf32>
    %cst_64 = arith.constant dense<0.000000e+00> : vector<128xf32>
    %92 = vector.multi_reduction <add>, %91, %cst_64 [0] : vector<8x128xf32> to vector<128xf32>
    %93 = vector.shape_cast %92 : vector<128xf32> to vector<1x128xf32>
    %94 = arith.addf %83, %93 : vector<1x128xf32>
    %95 = vector.extract_strided_slice %26 {offsets = [61, 0], sizes = [8, 128], strides = [1, 1]} : vector<80x128xf32> to vector<8x128xf32>
    %c0_65 = arith.constant 0 : index
    %c6 = arith.constant 6 : index
    %c0_66 = arith.constant 0 : index
    %c0_67 = arith.constant 0 : index
    %96 = vector.load %arg4[%c0_65, %c6, %c0_66, %c0_67] : memref<1x8x8x128xf32, #tpu.memory_space<vmem>>, vector<1x1x8x128xf32>
    %97 = vector.shape_cast %96 : vector<1x1x8x128xf32> to vector<8x128xf32>
    %98 = vector.shape_cast %95 : vector<8x128xf32> to vector<1x1x8x128xf32>
    tpu.vector_store %arg4[%c0_65, %c6, %c0_66, %c0_67], %98 {strides = array<i32>} : memref<1x8x8x128xf32, #tpu.memory_space<vmem>>, vector<1x1x8x128xf32>,
    %cst_68 = arith.constant dense<0.000000e+00> : vector<128xf32>
    %99 = vector.multi_reduction <add>, %95, %cst_68 [0] : vector<8x128xf32> to vector<128xf32>
    %100 = vector.shape_cast %99 : vector<128xf32> to vector<1x128xf32>
    %101 = arith.addf %90, %100 : vector<1x128xf32>
    %102 = arith.mulf %95, %95 : vector<8x128xf32>
    %cst_69 = arith.constant dense<0.000000e+00> : vector<128xf32>
    %103 = vector.multi_reduction <add>, %102, %cst_69 [0] : vector<8x128xf32> to vector<128xf32>
    %104 = vector.shape_cast %103 : vector<128xf32> to vector<1x128xf32>
    %105 = arith.addf %94, %104 : vector<1x128xf32>
    %106 = vector.extract_strided_slice %26 {offsets = [71, 0], sizes = [8, 128], strides = [1, 1]} : vector<80x128xf32> to vector<8x128xf32>
    %c0_70 = arith.constant 0 : index
    %c7 = arith.constant 7 : index
    %c0_71 = arith.constant 0 : index
    %c0_72 = arith.constant 0 : index
    %107 = vector.load %arg4[%c0_70, %c7, %c0_71, %c0_72] : memref<1x8x8x128xf32, #tpu.memory_space<vmem>>, vector<1x1x8x128xf32>
    %108 = vector.shape_cast %107 : vector<1x1x8x128xf32> to vector<8x128xf32>
    %109 = vector.shape_cast %106 : vector<8x128xf32> to vector<1x1x8x128xf32>
    tpu.vector_store %arg4[%c0_70, %c7, %c0_71, %c0_72], %109 {strides = array<i32>} : memref<1x8x8x128xf32, #tpu.memory_space<vmem>>, vector<1x1x8x128xf32>,
    %cst_73 = arith.constant dense<0.000000e+00> : vector<128xf32>
    %110 = vector.multi_reduction <add>, %106, %cst_73 [0] : vector<8x128xf32> to vector<128xf32>
    %111 = vector.shape_cast %110 : vector<128xf32> to vector<1x128xf32>
    %112 = arith.addf %101, %111 : vector<1x128xf32>
    %113 = arith.mulf %106, %106 : vector<8x128xf32>
    %cst_74 = arith.constant dense<0.000000e+00> : vector<128xf32>
    %114 = vector.multi_reduction <add>, %113, %cst_74 [0] : vector<8x128xf32> to vector<128xf32>
    %115 = vector.shape_cast %114 : vector<128xf32> to vector<1x128xf32>
    %116 = arith.addf %105, %115 : vector<1x128xf32>
    %c0_75 = arith.constant 0 : index
    %c0_76 = arith.constant 0 : index
    %c0_77 = arith.constant 0 : index
    %c0_78 = arith.constant 0 : index
    %117 = vector.load %arg5[%c0_75, %c0_76, %c0_77, %c0_78] : memref<1x1x1x128xf32, #tpu.memory_space<vmem>>, vector<1x1x1x128xf32>
    %118 = vector.shape_cast %117 : vector<1x1x1x128xf32> to vector<1x128xf32>
    %119 = vector.shape_cast %112 : vector<1x128xf32> to vector<1x1x1x128xf32>
    tpu.vector_store %arg5[%c0_75, %c0_76, %c0_77, %c0_78], %119 {strides = array<i32>} : memref<1x1x1x128xf32, #tpu.memory_space<vmem>>, vector<1x1x1x128xf32>,
    %c0_79 = arith.constant 0 : index
    %c0_80 = arith.constant 0 : index
    %c0_81 = arith.constant 0 : index
    %c0_82 = arith.constant 0 : index
    %120 = vector.load %arg6[%c0_79, %c0_80, %c0_81, %c0_82] : memref<1x1x1x128xf32, #tpu.memory_space<vmem>>, vector<1x1x1x128xf32>
    %121 = vector.shape_cast %120 : vector<1x1x1x128xf32> to vector<1x128xf32>
    %122 = vector.shape_cast %116 : vector<1x128xf32> to vector<1x1x1x128xf32>
    tpu.vector_store %arg6[%c0_79, %c0_80, %c0_81, %c0_82], %122 {strides = array<i32>} : memref<1x1x1x128xf32, #tpu.memory_space<vmem>>, vector<1x1x1x128xf32>,
    return
  }
  func.func @transform_0(%arg0: i32, %arg1: i32) -> (i32, i32, i32) {
    %c0_i32 = arith.constant 0 : i32
    %c0_i32_0 = arith.constant 0 : i32
    %c0_i32_1 = arith.constant 0 : i32
    return %arg0, %c0_i32, %c0_i32_0 : i32, i32, i32
  }
  func.func @transform_1(%arg0: i32, %arg1: i32) -> (i32, i32) {
    %c0_i32 = arith.constant 0 : i32
    %c0_i32_0 = arith.constant 0 : i32
    %c0_i32_1 = arith.constant 0 : i32
    return %c0_i32, %c0_i32_0 : i32, i32
  }
  func.func @transform_2(%arg0: i32, %arg1: i32) -> (i32, i32, i32, i32) {
    %c0_i32 = arith.constant 0 : i32
    %c0_i32_0 = arith.constant 0 : i32
    %c0_i32_1 = arith.constant 0 : i32
    return %arg0, %arg1, %c0_i32, %c0_i32_0 : i32, i32, i32, i32
  }
  func.func @transform_3(%arg0: i32, %arg1: i32) -> (i32, i32, i32, i32) {
    %c0_i32 = arith.constant 0 : i32
    %c0_i32_0 = arith.constant 0 : i32
    %c0_i32_1 = arith.constant 0 : i32
    return %arg0, %arg1, %c0_i32, %c0_i32_0 : i32, i32, i32, i32
  }
  func.func @transform_4(%arg0: i32, %arg1: i32) -> (i32, i32, i32, i32) {
    %c0_i32 = arith.constant 0 : i32
    %c0_i32_0 = arith.constant 0 : i32
    %c0_i32_1 = arith.constant 0 : i32
    return %arg0, %arg1, %c0_i32, %c0_i32_0 : i32, i32, i32, i32
  }
}

</mosaic_0001>

<bundles_post_ra>
// kernel: tpu_custom_call.1
= control target key start
LH: loop header
LB: loop body
LE: loop exit
PB: predicated region body
PF: predicated region fallthrough
CT: control target
= control target key end

     0   :  { %10 = vsyncpa [#allocation5], 0  ;;  %s2185_s0 = inlined_call_operand.vmem [shape: f32[2,102,4], index: 0, kind: input, shape index: {}]   ;;  %s2186_s1 = inlined_call_operand.vmem [shape: f32[36,128], index: 1, kind: input, shape index: {}]   ;;  %s2187_s2 = inlined_call_operand.hbm [shape: f32[2,8,8,128], index: 2, kind: output, shape index: {0}]   ;;  %s2188_s3 = inlined_call_operand.hbm [shape: f32[2,1,1,128], index: 3, kind: output, shape index: {1}]   ;;  %s2189_s4 = inlined_call_operand.hbm [shape: f32[2,1,1,128], index: 4, kind: output, shape index: {2}]  }
   0x1   :  { %12 = vsyncpa [#allocation5 + $0x1], 0 }
   0x2   :  { %13 = vsyncpa [#allocation7], 0 }
   0x3   :  { %15 = vsyncpa [#allocation7 + $0x1], 0  ;;  %s1697_s15 = smov 0   ;;  %s1699_s16 = smov 0  }
   0x4   :  { %s1701_s17 = smov 0   ;;  %s1703_s18 = smov 0  }
   0x5   :  { %s1705_s19 = smov 0   ;;  %s1707_s20 = smov 0  }
   0x6 LB: > { %s1351_s21 = sadd.s32 4294967295, %s1658_s20   ;;  %s1352_s22 = sadd.s32 4294967294, %s1658_s20   ;;  %s1658_s20 = sphi %s1707_s20, %s21_s20   ;;  %s1654_s19 = sphi %s1705_s19, %s2196_s19   ;;  %s1650_s18 = sphi %s1703_s18, %s2195_s18   ;;  %s1646_s17 = sphi %s1701_s17, %s2194_s17   ;;  %s1642_s16 = sphi %s1699_s16, %s2193_s16   ;;  %s1638_s15 = sphi %s1697_s15, %s2192_s15  }
   0x7   : > { %s33_s23 = sadd.s32 1, %s1654_s19  ;;  %s89_s24 = sadd.s32 1, %s1646_s17 }
   0x8   : > { %p35_p0 = scmp.ge.s32.totalorder %s33_s23, 2  ;;  %p99_p1 = scmp.ne.s32.totalorder %s1646_s17, %s1642_s16 }
   0x9   : > { %p100_p2 = scmp.eq.s32.totalorder %s1351_s21, 1  ;;  %p105_p3 = scmp.ne.s32.totalorder %s1642_s16, %s1638_s15 }
   0xa   : > { %s2198_s23 = smov (%p35_p0, %s33_s23), 0  ;;  %p106_p5 = scmp.eq.s32.totalorder %s1352_s22, 1 }
   0xb   : > { %p1739_p4 = por %p100_p2, %p99_p1  ;;  %s84_s26 = ssub.s32 %s1654_s19, %s2198_s23 }
   0xc   : > { %p1355_p6 = scmp.ge.s32.totalorder %s1658_s20, 1  ;;  %p87_p7 = scmp.eq.s32.totalorder %s84_s26, 0 }
   0xd   : > { %p1748_p8 = por %p106_p5, %p105_p3  ;;  %p191_p9 = scmp.lt.s32.totalorder %s1658_s20, 3 }
   0xe   : > { %s1754_s28 = scalar_select %p87_p7, %s1646_s17, %s89_s24  }
   0xf   : > { %p192_p10 = pnand %p1355_p6, %p191_p9 }
  0x10   : > { %p225_p11 = scmp.lt.s32.totalorder (!%p192_p10), %s1650_s18, 1  ;;  %vm246_vm0 = vcmask (!%p192_p10), 31744   ;;  %s1660_s8 = smov (!%p192_p10), 8   ;;  %vm259_vm1 = vcmask (!%p192_p10), 29696   ;;  %v779_v32 = vld [vmem:[%s2186_s1] sm:$0xff] (!%p192_p10)  ;;  %v780_v33 = vld [vmem:[%s2186_s1 + $0x8] sm:$0xff] (!%p192_p10) }
  0x11   : > { %195 = sbr.rel (%p192_p10) target bundleno = 599 (0x257), region = 28  ;;  %s1661_s9 = smov (!%p192_p10), 4   ;;  %v1431_v34 = vpack.c.bf16 (!%p192_p10), %v780_v33, %v779_v32  ;;  %v781_v37 = vld [vmem:[%s2186_s1 + $0x10] sm:$0xff] (!%p192_p10)  ;;  %v782_v38 = vld [vmem:[%s2186_s1 + $0x18] sm:$0xff] (!%p192_p10)  ;;  %v783_v43 = vld [vmem:[%s2186_s1 + $0x20] sm:$0xf] (!%p192_p10) }
  0x12   : > { %s1662_s10 = smov (!%p192_p10), 12   ;;  %s1663_s11 = smov (!%p192_p10), 16   ;;  %v1435_v39 = vpack.c.bf16 (!%p192_p10), %v782_v38, %v781_v37  ;;  %vm815_vm2 = vcmask (!%p192_p10), 1043456   ;;  %vm331_vm3 = vcmask (!%p192_p10), 64544   ;;  %vm392_vm4 = vcmask (!%p192_p10), 97344  }
  0x13   : > { %s1664_s12 = smov (!%p192_p10), 20   ;;  %s1665_s13 = smov (!%p192_p10), 24   ;;  %1432 = vmatprep.subr.bf16.mxu0 (!%p192_p10), %v1431_v34  ;;  %1439 = vmatprep.subr.bf16.mxu1 (!%p192_p10), %v1431_v34  ;;  %vm453_vm5 = vcmask (!%p192_p10), 130144   ;;  %vm514_vm6 = vcmask (!%p192_p10), 162944   ;;  %vm575_vm7 = vcmask (!%p192_p10), 195744   ;;  %vm636_vm8 = vcmask (!%p192_p10), 228544  }
  0x14   : > { %1434 = vmatpush3.bf16.msra.mxu0 (!%p192_p10), %v1431_v34  ;;  %1442 = vmatpush3.bf16.msra.mxu1 (!%p192_p10), %v1431_v34  ;;  %vm697_vm9 = vcmask (!%p192_p10), 261344   ;;  %vm758_vm10 = vcmask (!%p192_p10), 294144   ;;  %vm784_vm11 = vcmask (!%p192_p10), 293888   ;;  %vm938_vm12 = vcmask (!%p192_p10), 1046528   ;;  %s1668_s24 = smov (!%p192_p10), [#allocation4]  }
  0x15   : > { %1436 = vmatprep.subr.bf16.mxu0 (!%p192_p10), %v1435_v39  ;;  %1440 = vmatprep.subr.bf16.mxu1 (!%p192_p10), %v1435_v39  ;;  %vm969_vm13 = vcmask (!%p192_p10), 1044480   ;;  %vm998_vm14 = vcmask (!%p192_p10), 1042432   ;;  %vm1027_vm15 = vcmask (!%p192_p10), 1040384   ;;  %s1524_s26 = sshll.u32 (!%p192_p10), %s1668_s24, 4  ;;  %s1525_s26 = int_to_ptr.vmem [resolvable:$false] %s1524_s26 }
  0x18   : > { %s226_s29 = scalar_select %p225_p11, %s1650_s18, 1  ;;  %1438 = vmatpush3.bf16.msra.mxu0 %v1435_v39  ;;  %1443 = vmatpush3.bf16.msra.mxu1 %v1435_v39 }
  0x19   : > { %1414 = vmatprep.subr.msk.mxu0 %vm815_vm2, %v783_v43  ;;  %1441 = vmatprep.subr.msk.mxu1 %vm815_vm2, %v783_v43 }
  0x1a   : > { %s1445_s30 = smul.u32 104, %s226_s29  ;;  %s1667_s29 = smov 32  }
  0x1c   : > { %s1761_s7 = scalar_lea.vmem %s2185_s0, %s1445_s30  ;;  %s1666_s30 = smov 28   ;;  %1415 = vmatpush3.msk.msra.mxu0 %vm815_vm2, %v783_v43  ;;  %1444 = vmatpush3.msk.msra.mxu1 %vm815_vm2, %v783_v43 }
  0x1d   : > { %v233_v0 = vld [vmem:[%s1761_s7] sm:$0xff]  ;;  %v234_v1 = vld [vmem:[%s1761_s7 + $0x8] sm:$0xff]  ;;  %v235_v2 = vld [vmem:[%s1761_s7 + $0x10] sm:$0xff] }
  0x1e   : > { %247 = vst.msk [vmem:[#allocation2] sm:$0xff] %vm246_vm0, %v233_v0  ;;  %248 = vst.msk [vmem:[#allocation2 + $0x8] sm:$0xff] %vm246_vm0, %v234_v1  ;;  %v236_v3 = vld [vmem:[%s1761_s7 + $0x18] sm:$0xff]  ;;  %v237_v4 = vld [vmem:[%s1761_s7 + $0x20] sm:$0xff] }
  0x1f   : > { %249 = vst.msk [vmem:[#allocation2 + $0x10] sm:$0xff] %vm246_vm0, %v235_v2  ;;  %v238_v5 = vld [vmem:[%s1761_s7 + $0x28] sm:$0xff]  ;;  %250 = vst.msk [vmem:[#allocation2 + $0x18] sm:$0xff] %vm246_vm0, %v236_v3  ;;  %v239_v6 = vld [vmem:[%s1761_s7 + $0x30] sm:$0xff] }
  0x20   : > { %251 = vst.msk [vmem:[#allocation2 + $0x20] sm:$0xff] %vm246_vm0, %v237_v4  ;;  %252 = vst.msk [vmem:[#allocation2 + $0x28] sm:$0xff] %vm246_vm0, %v238_v5  ;;  %v240_v7 = vld [vmem:[%s1761_s7 + $0x38] sm:$0xff]  ;;  %v241_v8 = vld [vmem:[%s1761_s7 + $0x40] sm:$0xff] }
  0x21   : > { %253 = vst.msk [vmem:[#allocation2 + $0x30] sm:$0xff] %vm246_vm0, %v239_v6  ;;  %254 = vst.msk [vmem:[#allocation2 + $0x38] sm:$0xff] %vm246_vm0, %v240_v7  ;;  %v242_v9 = vld [vmem:[%s1761_s7 + $0x48] sm:$0xff]  ;;  %v243_v10 = vld [vmem:[%s1761_s7 + $0x50] sm:$0xff] }
  0x22   : > { %255 = vst.msk [vmem:[#allocation2 + $0x40] sm:$0xff] %vm246_vm0, %v241_v8  ;;  %256 = vst.msk [vmem:[#allocation2 + $0x48] sm:$0xff] %vm246_vm0, %v242_v9  ;;  %v244_v11 = vld [vmem:[%s1761_s7 + $0x58] sm:$0xff]  ;;  %v245_v26 = vld [vmem:[%s1761_s7 + $0x60] sm:$0x3f] }
  0x23   : > { %257 = vst.msk [vmem:[#allocation2 + $0x50] sm:$0xff] %vm246_vm0, %v243_v10  ;;  %258 = vst.msk [vmem:[#allocation2 + $0x58] sm:$0xff] %vm246_vm0, %v244_v11 }
  0x24   : > { %260 = vst.msk [vmem:[#allocation2 + $0x60] sm:$0x3f] %vm259_vm1, %v245_v26 }
  0x25   : > { %v342_v12 = vld [vmem:[#allocation2 + $0x2] sm:$0xff] }
  0x26   : > { %v281_v13 = vld [vmem:[#allocation2 + $0x1] sm:$0xff]  ;;  %362 = vrot.lane.b32.xlu1 %v342_v12, %s1660_s8  ;;  %v343_v14 = vld [vmem:[#allocation2 + $0xa] sm:$0xff]  ;;  %v404_v16 = vld [vmem:[#allocation2 + $0x12] sm:$0xff] }
  0x27   : > { %301 = vrot.lane.b32.xlu0 %v281_v13, %s1661_s9  ;;  %v282_v15 = vld [vmem:[#allocation2 + $0x9] sm:$0xff]  ;;  %v283_v17 = vld [vmem:[#allocation2 + $0x11] sm:$0xff]  ;;  %v261_v21 = vld [vmem:[#allocation2] sm:$0xff] }
  0x28   : > { %v464_v18 = vld [vmem:[#allocation2 + $0xb] sm:$0xff]  ;;  %v465_v20 = vld [vmem:[#allocation2 + $0x13] sm:$0xff]  ;;  %271 = vst.msk [vmem:[#allocation3] sm:$0xff] %vm246_vm0, %v261_v21  ;;  %v587_v30 = vld [vmem:[#allocation2 + $0x1c] sm:$0xff] }
  0x29   : > { %v525_v19 = vld [vmem:[#allocation2 + $0xc] sm:$0xff]  ;;  %v284_v24 = vld [vmem:[#allocation2 + $0x19] sm:$0xff]  ;;  %v406_v36 = vld [vmem:[#allocation2 + $0x22] sm:$0xff] }
  0x2a   : > { %364 = vrot.lane.b32.xlu1 %v343_v14, %s1660_s8  ;;  %v262_v22 = vld [vmem:[#allocation2 + $0x8] sm:$0xff]  ;;  %v263_v23 = vld [vmem:[#allocation2 + $0x10] sm:$0xff]  ;;  %v264_v25 = vld [vmem:[#allocation2 + $0x18] sm:$0xff] }
  0x2b   : > { %303 = vrot.lane.b32.xlu0 %v282_v15, %s1661_s9  ;;  %272 = vst.msk [vmem:[#allocation3 + $0x8] sm:$0xff] %vm246_vm0, %v262_v22  ;;  %273 = vst.msk [vmem:[#allocation3 + $0x10] sm:$0xff] %vm246_vm0, %v263_v23  ;;  %v586_v27 = vld [vmem:[#allocation2 + $0x14] sm:$0xff]  ;;  %v265_v31 = vld [vmem:[#allocation2 + $0x20] sm:$0xff] }
  0x2c   : > { %274 = vst.msk [vmem:[#allocation3 + $0x18] sm:$0xff] %vm246_vm0, %v264_v25  ;;  %v405_v28 = vld [vmem:[#allocation2 + $0x1a] sm:$0xff]  ;;  %275 = vst.msk [vmem:[#allocation3 + $0x20] sm:$0xff] %vm246_vm0, %v265_v31  ;;  %v266_v42 = vld [vmem:[#allocation2 + $0x28] sm:$0xff] }
  0x2d   : > { %v647_v29 = vld [vmem:[#allocation2 + $0x15] sm:$0xff]  ;;  %v648_v41 = vld [vmem:[#allocation2 + $0x1d] sm:$0xff]  ;;  %276 = vst.msk [vmem:[#allocation3 + $0x28] sm:$0xff] %vm246_vm0, %v266_v42  ;;  %v286_v48 = vld [vmem:[#allocation2 + $0x29] sm:$0xff] }
  0x2e   : > { %425 = vrot.lane.b32.xlu1 %v404_v16, %s1662_s10  ;;  %v466_v35 = vld [vmem:[#allocation2 + $0x1b] sm:$0xff]  ;;  %v467_v44 = vld [vmem:[#allocation2 + $0x23] sm:$0xff]  ;;  %v267_v47 = vld [vmem:[#allocation2 + $0x30] sm:$0xff] }
  0x2f   : > { %423 = vrot.lane.b32.xlu0 %v343_v14, %s1662_s10  ;;  %v708_v40 = vld [vmem:[#allocation2 + $0x16] sm:$0xff]  ;;  %v285_v45 = vld [vmem:[#allocation2 + $0x21] sm:$0xff]  ;;  %277 = vst.msk [vmem:[#allocation3 + $0x30] sm:$0xff] %vm246_vm0, %v267_v47  ;;  %v347_v51 = vld [vmem:[#allocation2 + $0x2a] sm:$0xff] }
  0x30   : > { %v709_v46 = vld [vmem:[#allocation2 + $0x1e] sm:$0xff]  ;;  %v287_v52 = vld [vmem:[#allocation2 + $0x31] sm:$0xff]  ;;  %v710_v60 = vld [vmem:[#allocation2 + $0x26] sm:$0xff] }
  0x31   : > { %v268_v49 = vld [vmem:[#allocation2 + $0x38] sm:$0xff]  ;;  %v588_v50 = vld [vmem:[#allocation2 + $0x24] sm:$0xff]  ;;  %v589_v53 = vld [vmem:[#allocation2 + $0x2c] sm:$0xff] }
  0x32   : > { %305 = vrot.lane.b32.xlu1 %v283_v17, %s1661_s9  ;;  %278 = vst.msk [vmem:[#allocation3 + $0x38] sm:$0xff] %vm246_vm0, %v268_v49  ;;  %v288_v54 = vld [vmem:[#allocation2 + $0x39] sm:$0xff]  ;;  %v649_v55 = vld [vmem:[#allocation2 + $0x25] sm:$0xff]  ;;  %v650_v57 = vld [vmem:[#allocation2 + $0x2d] sm:$0xff] }
  0x33   : > { %484 = vrot.lane.b32.xlu0 %v464_v18, %s1663_s11  ;;  %v408_v56 = vld [vmem:[#allocation2 + $0x32] sm:$0xff]  ;;  %v349_v59 = vld [vmem:[#allocation2 + $0x3a] sm:$0xff]  ;;  %v410_v1 = vld [vmem:[#allocation2 + $0x42] sm:$0xff] }
  0x34   : > { %v468_v58 = vld [vmem:[#allocation2 + $0x2b] sm:$0xff]  ;;  %v469_v61 = vld [vmem:[#allocation2 + $0x33] sm:$0xff]  ;;  %v269_v63 = vld [vmem:[#allocation2 + $0x40] sm:$0xff] }
  0x35   : > { %v711_v62 = vld [vmem:[#allocation2 + $0x2e] sm:$0xff]  ;;  %279 = vst.msk [vmem:[#allocation3 + $0x40] sm:$0xff] %vm246_vm0, %v269_v63  ;;  %v470_v0 = vld [vmem:[#allocation2 + $0x3b] sm:$0xff]  ;;  %v471_v4 = vld [vmem:[#allocation2 + $0x43] sm:$0xff] }
  0x36   : > { %545 = vrot.lane.b32.xlu1 %v525_v19, %s1664_s12  ;;  %v270_v2 = vld [vmem:[#allocation2 + $0x48] sm:$0xff]  ;;  %v590_v3 = vld [vmem:[#allocation2 + $0x34] sm:$0xff]  ;;  %v591_v6 = vld [vmem:[#allocation2 + $0x3c] sm:$0xff] }
  0x37   : > { %486 = vrot.lane.b32.xlu0 %v465_v20, %s1663_s11  ;;  %280 = vst.msk [vmem:[#allocation3 + $0x48] sm:$0xff] %vm246_vm0, %v270_v2  ;;  %v289_v5 = vld [vmem:[#allocation2 + $0x41] sm:$0xff]  ;;  %v290_v7 = vld [vmem:[#allocation2 + $0x49] sm:$0xff]  ;;  %v651_v8 = vld [vmem:[#allocation2 + $0x35] sm:$0xff] }
  0x38   : > { %v532_v9 = vld [vmem:[#allocation2 + $0x44] sm:$0xff]  ;;  %v712_v14 = vld [vmem:[#allocation2 + $0x36] sm:$0xff]  ;;  %v593_v17 = vld [vmem:[#allocation2 + $0x4c] sm:$0xff] }
  0x39   : > { %v652_v10 = vld [vmem:[#allocation2 + $0x3d] sm:$0xff]  ;;  %v351_v13 = vld [vmem:[#allocation2 + $0x4a] sm:$0xff]  ;;  %v473_v32 = vld [vmem:[#allocation2 + $0x53] sm:$0xff] }
  0x3a   : > { %366 = vrot.lane.b32.xlu1 %v404_v16, %s1660_s8  ;;  %v713_v20 = vld [vmem:[#allocation2 + $0x3e] sm:$0xff]  ;;  %v472_v25 = vld [vmem:[#allocation2 + $0x4b] sm:$0xff]  ;;  %v655_v42 = vld [vmem:[#allocation2 + $0x55] sm:$0xff] }
  0x3b   : > { %307 = vrot.lane.b32.xlu0 %v284_v24, %s1661_s9  ;;  %v653_v21 = vld [vmem:[#allocation2 + $0x45] sm:$0xff]  ;;  %v412_v24 = vld [vmem:[#allocation2 + $0x52] sm:$0xff]  ;;  %v595_v39 = vld [vmem:[#allocation2 + $0x5c] sm:$0xff] }
  0x3c   : > { %v656_v43 = vld [vmem:[#allocation2 + $0x5d] sm:$0xff] }
  0x3d   : > { %v717_v47 = vld [vmem:[#allocation2 + $0x5e] sm:$0xff] }
  0x3e   : > { %606 = vrot.lane.b32.xlu1 %v586_v27, %s1665_s13 }
  0x3f   : > { %547 = vrot.lane.b32.xlu0 %v586_v27, %s1664_s12 }
  0x42   : > { %427 = vrot.lane.b32.xlu1 %v405_v28, %s1662_s10 }
  0x43   : > { %368 = vrot.lane.b32.xlu0 %v405_v28, %s1660_s8  ;;  %v654_v28 = vld [vmem:[#allocation2 + $0x4d] sm:$0xff] }
  0x46   : > { %667 = vrot.lane.b32.xlu1 %v647_v29, %s1666_s30  ;;  %v714_v29 = vld [vmem:[#allocation2 + $0x46] sm:$0xff] }
  0x47   : > { %608 = vrot.lane.b32.xlu0 %v587_v30, %s1665_s13 }
  0x4a   : > { %488 = vrot.lane.b32.xlu1 %v466_v35, %s1663_s11  ;;  %v715_v35 = vld [vmem:[#allocation2 + $0x4e] sm:$0xff] }
  0x4b   : > { %429 = vrot.lane.b32.xlu0 %v406_v36, %s1662_s10 }
  0x4e   : > { %728 = vrot.lane.b32.xlu1 %v708_v40, %s1667_s29 }
  0x4f   : > { %669 = vrot.lane.b32.xlu0 %v648_v41, %s1666_s30 }
  0x52   : > { %490 = vrot.lane.b32.xlu1 %v467_v44, %s1663_s11 }
  0x53   : > { %309 = vrot.lane.b32.xlu0 %v285_v45, %s1661_s9 }
  0x56   : > { %730 = vrot.lane.b32.xlu1 %v709_v46, %s1667_s29  ;;  %v716_v46 = vld [vmem:[#allocation2 + $0x56] sm:$0xff] }
  0x57   : > { %549 = vrot.lane.b32.xlu0 %v587_v30, %s1664_s12 }
  0x5a   : > { %370 = vrot.lane.b32.xlu1 %v406_v36, %s1660_s8  ;;  %v534_v36 = vld [vmem:[#allocation2 + $0x54] sm:$0xff] }
  0x5b   : > { %311 = vrot.lane.b32.xlu0 %v286_v48, %s1661_s9 }
  0x5e   : > { %610 = vrot.lane.b32.xlu1 %v588_v50, %s1665_s13 }
  0x5f   : > { %551 = vrot.lane.b32.xlu0 %v588_v50, %s1664_s12 }
  0x62   : > { %372 = vrot.lane.b32.xlu1 %v347_v51, %s1660_s8 }
  0x63   : > { %313 = vrot.lane.b32.xlu0 %v287_v52, %s1661_s9 }
  0x66   : > { %612 = vrot.lane.b32.xlu1 %v589_v53, %s1665_s13 }
  0x67   : > { %431 = vrot.lane.b32.xlu0 %v347_v51, %s1662_s10 }
  0x6a   : > { %315 = vrot.lane.b32.xlu1 %v288_v54, %s1661_s9 }
  0x6b   : > { %671 = vrot.lane.b32.xlu0 %v649_v55, %s1666_s30 }
  0x6e   : > { %433 = vrot.lane.b32.xlu1 %v408_v56, %s1662_s10 }
  0x6f   : > { %374 = vrot.lane.b32.xlu0 %v408_v56, %s1660_s8 }
  0x72   : > { %673 = vrot.lane.b32.xlu1 %v650_v57, %s1666_s30 }
  0x73   : > { %492 = vrot.lane.b32.xlu0 %v468_v58, %s1663_s11 }
  0x76   : > { %376 = vrot.lane.b32.xlu1 %v349_v59, %s1660_s8 }
  0x77   : > { %732 = vrot.lane.b32.xlu0 %v710_v60, %s1667_s29 }
  0x7a   : > { %494 = vrot.lane.b32.xlu1 %v469_v61, %s1663_s11 }
  0x7b   : > { %435 = vrot.lane.b32.xlu0 %v349_v59, %s1662_s10 }
  0x7e   : > { %734 = vrot.lane.b32.xlu1 %v711_v62, %s1667_s29 }
  0x7f   : > { %553 = vrot.lane.b32.xlu0 %v589_v53, %s1664_s12 }
  0x82   : > { %496 = vrot.lane.b32.xlu1 %v470_v0, %s1663_s11 }
  0x83   : > { %437 = vrot.lane.b32.xlu0 %v410_v1, %s1662_s10 }
  0x86   : > { %614 = vrot.lane.b32.xlu1 %v590_v3, %s1665_s13 }
  0x87   : > { %555 = vrot.lane.b32.xlu0 %v590_v3, %s1664_s12 }
  0x8a   : > { %498 = vrot.lane.b32.xlu1 %v471_v4, %s1663_s11 }
  0x8b   : > { %317 = vrot.lane.b32.xlu0 %v289_v5, %s1661_s9 }
  0x8e   : > { %616 = vrot.lane.b32.xlu1 %v591_v6, %s1665_s13 }
  0x8f   : > { %557 = vrot.lane.b32.xlu0 %v591_v6, %s1664_s12 }
  0x92   : > { %319 = vrot.lane.b32.xlu1 %v290_v7, %s1661_s9  ;;  %s1984_s9 = sand.u32 1, %s1642_s16  }
  0x93   : > { %675 = vrot.lane.b32.xlu0 %v651_v8, %s1666_s30  ;;  %s1170_s7 = scalar_lea.sflag [#allocation5], %s1984_s9 }
  0x96   : > { %559 = vrot.lane.b32.xlu1 %v532_v9, %s1664_s12 }
  0x97   : > { %378 = vrot.lane.b32.xlu0 %v410_v1, %s1660_s8 }
  0x98   : > { %v363_v11 = vpop.permute.xlu1 %362 }
  0x99   : > { %v302_v12 = vpop.permute.xlu0 %301 }
  0x9a   : > { %332 = vst.msk [vmem:[#allocation3] sm:$0xff] %vm331_vm3, %v302_v12  ;;  %677 = vrot.lane.b32.xlu1 %v652_v10, %s1666_s30 }
  0x9b   : > { %618 = vrot.lane.b32.xlu0 %v532_v9, %s1665_s13  ;;  %393 = vst.msk [vmem:[#allocation3] sm:$0xff] %vm392_vm4, %v363_v11 }
  0x9c   : > { %v365_v15 = vpop.permute.xlu1 %364 }
  0x9d   : > { %v304_v16 = vpop.permute.xlu0 %303 }
  0x9e   : > { %333 = vst.msk [vmem:[#allocation3 + $0x8] sm:$0xff] %vm331_vm3, %v304_v16  ;;  %380 = vrot.lane.b32.xlu1 %v351_v13, %s1660_s8 }
  0x9f   : > { %736 = vrot.lane.b32.xlu0 %v712_v14, %s1667_s29  ;;  %394 = vst.msk [vmem:[#allocation3 + $0x8] sm:$0xff] %vm392_vm4, %v365_v15 }
  0xa0   : > { %v426_v18 = vpop.permute.xlu1 %425 }
  0xa1   : > { %v424_v19 = vpop.permute.xlu0 %423  ;;  %455 = vst.msk [vmem:[#allocation3 + $0x8] sm:$0xff] %vm453_vm5, %v426_v18 }
  0xa2   : > { %454 = vst.msk [vmem:[#allocation3] sm:$0xff] %vm453_vm5, %v424_v19  ;;  %620 = vrot.lane.b32.xlu1 %v593_v17, %s1665_s13 }
  0xa3   : > { %439 = vrot.lane.b32.xlu0 %v351_v13, %s1662_s10 }
  0xa4   : > { %v306_v22 = vpop.permute.xlu1 %305 }
  0xa5   : > { %v485_v23 = vpop.permute.xlu0 %484  ;;  %334 = vst.msk [vmem:[#allocation3 + $0x10] sm:$0xff] %vm331_vm3, %v306_v22 }
  0xa6   : > { %515 = vst.msk [vmem:[#allocation3] sm:$0xff] %vm514_vm6, %v485_v23  ;;  %738 = vrot.lane.b32.xlu1 %v713_v20, %s1667_s29 }
  0xa7   : > { %679 = vrot.lane.b32.xlu0 %v653_v21, %s1666_s30 }
  0xa8   : > { %v546_v26 = vpop.permute.xlu1 %545 }
  0xa9   : > { %v487_v27 = vpop.permute.xlu0 %486  ;;  %576 = vst.msk [vmem:[#allocation3] sm:$0xff] %vm575_vm7, %v546_v26 }
  0xaa   : > { %516 = vst.msk [vmem:[#allocation3 + $0x8] sm:$0xff] %vm514_vm6, %v487_v27  ;;  %500 = vrot.lane.b32.xlu1 %v472_v25, %s1663_s11 }
  0xab   : > { %441 = vrot.lane.b32.xlu0 %v412_v24, %s1662_s10  ;;  %s1356_s10 = sshll.u32 %s1984_s9, 6 }
  0xac   : > { %v367_v30 = vpop.permute.xlu1 %366 }
  0xad   : > { %v308_v31 = vpop.permute.xlu0 %307  ;;  %395 = vst.msk [vmem:[#allocation3 + $0x10] sm:$0xff] %vm392_vm4, %v367_v30 }
  0xae   : > { %335 = vst.msk [vmem:[#allocation3 + $0x18] sm:$0xff] %vm331_vm3, %v308_v31  ;;  %740 = vrot.lane.b32.xlu1 %v714_v29, %s1667_s29 }
  0xaf   : > { %681 = vrot.lane.b32.xlu0 %v654_v28, %s1666_s30 }
  0xb0   : > { %v607_v33 = vpop.permute.xlu1 %606 }
  0xb1   : > { %v548_v34 = vpop.permute.xlu0 %547  ;;  %637 = vst.msk [vmem:[#allocation3] sm:$0xff] %vm636_vm8, %v607_v33 }
  0xb2   : > { %577 = vst.msk [vmem:[#allocation3 + $0x8] sm:$0xff] %vm575_vm7, %v548_v34  ;;  %561 = vrot.lane.b32.xlu1 %v593_v17, %s1664_s12 }
  0xb3   : > { %502 = vrot.lane.b32.xlu0 %v473_v32, %s1663_s11  ;;  %s1987_s11 = scalar_lea.vmem [#allocation4], %s1356_s10 }
  0xb4   : > { %v428_v37 = vpop.permute.xlu1 %427 }
  0xb5   : > { %v369_v38 = vpop.permute.xlu0 %368  ;;  %456 = vst.msk [vmem:[#allocation3 + $0x10] sm:$0xff] %vm453_vm5, %v428_v37 }
  0xb6   : > { %396 = vst.msk [vmem:[#allocation3 + $0x18] sm:$0xff] %vm392_vm4, %v369_v38  ;;  %563 = vrot.lane.b32.xlu1 %v534_v36, %s1664_s12  ;;  %s1390_s12 = sshll.u32 %s1650_s18, 10 }
  0xb7   : > { %742 = vrot.lane.b32.xlu0 %v715_v35, %s1667_s29  ;;  %s2047_s6 = scalar_lea.hbm %s2187_s2, %s1390_s12 }
  0xb8   : > { %v668_v40 = vpop.permute.xlu1 %667 }
  0xb9   : > { %v609_v41 = vpop.permute.xlu0 %608  ;;  %698 = vst.msk [vmem:[#allocation3] sm:$0xff] %vm697_vm9, %v668_v40 }
  0xba   : > { %638 = vst.msk [vmem:[#allocation3 + $0x8] sm:$0xff] %vm636_vm8, %v609_v41  ;;  %624 = vrot.lane.b32.xlu1 %v595_v39, %s1665_s13 }
  0xbb   : > { %622 = vrot.lane.b32.xlu0 %v534_v36, %s1665_s13  ;;  %s1193_s13 = sshll.u32 %s1987_s11, 4  ;;  %s2049_s13 = int_to_ptr.vmem [resolvable:$true] %s1193_s13 }
  0xbc   : > { %v489_v44 = vpop.permute.xlu1 %488  ;;  %s1520_s14 = scalar_lea.vmem %s2049_s13, 1024  ;;  %p1527_p1 = scmp.lt.s32.totalorder %s2049_s13, %s1525_s26 }
  0xbd   : > { %v430_v45 = vpop.permute.xlu0 %429  ;;  %517 = vst.msk [vmem:[#allocation3 + $0x10] sm:$0xff] %vm514_vm6, %v489_v44  ;;  %p1521_p12 = scmp.ne.s32.totalorder %s2049_s13, %s1520_s14 }
  0xbe   : > { %457 = vst.msk [vmem:[#allocation3 + $0x18] sm:$0xff] %vm453_vm5, %v430_v45  ;;  %685 = vrot.lane.b32.xlu1 %v656_v43, %s1666_s30 }
  0xbf   : > { %683 = vrot.lane.b32.xlu0 %v655_v42, %s1666_s30  ;;  %p1522_p13 = pnand %p1521_p12, %p1739_p4 }
  0xc0   : > { %v729_v48 = vpop.permute.xlu1 %728 }
  0xc1   : > { %v670_v49 = vpop.permute.xlu0 %669  ;;  %759 = vst.msk [vmem:[#allocation3] sm:$0xff] %vm758_vm10, %v729_v48  ;;  %p1523_p0 = pneg %p1522_p13 }
  0xc2   : > { %699 = vst.msk [vmem:[#allocation3 + $0x8] sm:$0xff] %vm697_vm9, %v670_v49  ;;  %746 = vrot.lane.b32.xlu1 %v717_v47, %s1667_s29 }
  0xc3   : > { %744 = vrot.lane.b32.xlu0 %v716_v46, %s1667_s29  ;;  %s1526_s29 = scalar_lea.vmem %s1525_s26, 2048 }
  0xc4   : > { %v491_v50 = vpop.permute.xlu1 %490  ;;  %p1528_p2 = scmp.lt.s32.totalorder %s1526_s29, %s1520_s14 }
  0xc5   : > { %v310_v51 = vpop.permute.xlu0 %309  ;;  %518 = vst.msk [vmem:[#allocation3 + $0x18] sm:$0xff] %vm514_vm6, %v491_v50 }
  0xc6   : > { %336 = vst.msk [vmem:[#allocation3 + $0x20] sm:$0xff] %vm331_vm3, %v310_v51  ;;  %p1529_p3 = por %p1528_p2, %p1527_p1 }
  0xc8   : > { %v731_v52 = vpop.permute.xlu1 %730  ;;  %v769_v54 = vld [vmem:[#allocation3] sm:$0xff]  ;;  %p1530_p5 = pnand %p1529_p3, %p1523_p0 }
  0xc9   : > { %v550_v53 = vpop.permute.xlu0 %549  ;;  %760 = vst.msk [vmem:[#allocation3 + $0x8] sm:$0xff] %vm758_vm10, %v731_v52  ;;  %1416 = vmatprep.mubr.msk.f32.mxu0 %vm784_vm11, %v769_v54 }
  0xca   : > { %578 = vst.msk [vmem:[#allocation3 + $0x10] sm:$0xff] %vm575_vm7, %v550_v53 }
  0xcc   : > { %v371_v55 = vpop.permute.xlu1 %370 }
  0xcd   : > { %v312_v56 = vpop.permute.xlu0 %311  ;;  %397 = vst.msk [vmem:[#allocation3 + $0x20] sm:$0xff] %vm392_vm4, %v371_v55 }
  0xce   : > { %337 = vst.msk [vmem:[#allocation3 + $0x28] sm:$0xff] %vm331_vm3, %v312_v56 }
  0xd0   : > { %v611_v57 = vpop.permute.xlu1 %610  ;;  %v770_v59 = vld [vmem:[#allocation3 + $0x8] sm:$0xff] }
  0xd1   : > { %v552_v58 = vpop.permute.xlu0 %551  ;;  %639 = vst.msk [vmem:[#allocation3 + $0x10] sm:$0xff] %vm636_vm8, %v611_v57  ;;  %1417 = vmatmul.mubr.msk.f32.vlgmr.msra.gmra.mrb[0].mxu0 %vm784_vm11, %v770_v59 }
  0xd2   : > { %579 = vst.msk [vmem:[#allocation3 + $0x18] sm:$0xff] %vm575_vm7, %v552_v58 }
  0xd4   : > { %v373_v60 = vpop.permute.xlu1 %372 }
  0xd5   : > { %v314_v61 = vpop.permute.xlu0 %313  ;;  %398 = vst.msk [vmem:[#allocation3 + $0x28] sm:$0xff] %vm392_vm4, %v373_v60 }
  0xd6   : > { %338 = vst.msk [vmem:[#allocation3 + $0x30] sm:$0xff] %vm331_vm3, %v314_v61 }
  0xd8   : > { %v613_v62 = vpop.permute.xlu1 %612 }
  0xd9   : > { %v432_v63 = vpop.permute.xlu0 %431  ;;  %640 = vst.msk [vmem:[#allocation3 + $0x18] sm:$0xff] %vm636_vm8, %v613_v62 }
  0xda   : > { %458 = vst.msk [vmem:[#allocation3 + $0x20] sm:$0xff] %vm453_vm5, %v432_v63 }
  0xdc   : > { %v316_v0 = vpop.permute.xlu1 %315 }
  0xdd   : > { %v672_v1 = vpop.permute.xlu0 %671  ;;  %339 = vst.msk [vmem:[#allocation3 + $0x38] sm:$0xff] %vm331_vm3, %v316_v0 }
  0xde   : > { %700 = vst.msk [vmem:[#allocation3 + $0x10] sm:$0xff] %vm697_vm9, %v672_v1 }
  0xe0   : > { %v434_v2 = vpop.permute.xlu1 %433 }
  0xe1   : > { %v375_v3 = vpop.permute.xlu0 %374  ;;  %459 = vst.msk [vmem:[#allocation3 + $0x28] sm:$0xff] %vm453_vm5, %v434_v2 }
  0xe2   : > { %399 = vst.msk [vmem:[#allocation3 + $0x30] sm:$0xff] %vm392_vm4, %v375_v3 }
  0xe4   : > { %v674_v4 = vpop.permute.xlu1 %673 }
  0xe5   : > { %v493_v5 = vpop.permute.xlu0 %492  ;;  %701 = vst.msk [vmem:[#allocation3 + $0x18] sm:$0xff] %vm697_vm9, %v674_v4 }
  0xe6   : > { %519 = vst.msk [vmem:[#allocation3 + $0x20] sm:$0xff] %vm514_vm6, %v493_v5 }
  0xe8   : > { %v377_v6 = vpop.permute.xlu1 %376 }
  0xe9   : > { %v733_v7 = vpop.permute.xlu0 %732  ;;  %400 = vst.msk [vmem:[#allocation3 + $0x38] sm:$0xff] %vm392_vm4, %v377_v6 }
  0xea   : > { %761 = vst.msk [vmem:[#allocation3 + $0x10] sm:$0xff] %vm758_vm10, %v733_v7 }
  0xec   : > { %v495_v8 = vpop.permute.xlu1 %494 }
  0xed   : > { %v436_v9 = vpop.permute.xlu0 %435  ;;  %520 = vst.msk [vmem:[#allocation3 + $0x28] sm:$0xff] %vm514_vm6, %v495_v8 }
  0xee   : > { %460 = vst.msk [vmem:[#allocation3 + $0x30] sm:$0xff] %vm453_vm5, %v436_v9 }
  0xf0   : > { %v735_v10 = vpop.permute.xlu1 %734 }
  0xf1   : > { %v554_v11 = vpop.permute.xlu0 %553  ;;  %v771_v12 = vld [vmem:[#allocation3 + $0x10] sm:$0xff]  ;;  %762 = vst.msk [vmem:[#allocation3 + $0x18] sm:$0xff] %vm758_vm10, %v735_v10 }
  0xf2   : > { %580 = vst.msk [vmem:[#allocation3 + $0x20] sm:$0xff] %vm575_vm7, %v554_v11  ;;  %1419 = vmatprep.mubr.msk.f32.mxu0 %vm784_vm11, %v771_v12 }
  0xf4   : > { %v497_v13 = vpop.permute.xlu1 %496 }
  0xf5   : > { %v438_v14 = vpop.permute.xlu0 %437  ;;  %521 = vst.msk [vmem:[#allocation3 + $0x30] sm:$0xff] %vm514_vm6, %v497_v13 }
  0xf6   : > { %461 = vst.msk [vmem:[#allocation3 + $0x38] sm:$0xff] %vm453_vm5, %v438_v14 }
  0xf8   : > { %v615_v15 = vpop.permute.xlu1 %614  ;;  %v772_v17 = vld [vmem:[#allocation3 + $0x18] sm:$0xff] }
  0xf9   : > { %v556_v16 = vpop.permute.xlu0 %555  ;;  %641 = vst.msk [vmem:[#allocation3 + $0x20] sm:$0xff] %vm636_vm8, %v615_v15  ;;  %1420 = vmatmul.mubr.msk.f32.gmra.mrb[2].mxu0 %vm784_vm11, %v772_v17 }
  0xfa   : > { %581 = vst.msk [vmem:[#allocation3 + $0x28] sm:$0xff] %vm575_vm7, %v556_v16 }
  0xfc   : > { %v499_v18 = vpop.permute.xlu1 %498 }
  0xfd   : > { %v318_v19 = vpop.permute.xlu0 %317  ;;  %522 = vst.msk [vmem:[#allocation3 + $0x38] sm:$0xff] %vm514_vm6, %v499_v18 }
  0xfe   : > { %340 = vst.msk [vmem:[#allocation3 + $0x40] sm:$0xff] %vm331_vm3, %v318_v19 }
 0x100   : > { %v617_v20 = vpop.permute.xlu1 %616 }
 0x101   : > { %v558_v21 = vpop.permute.xlu0 %557  ;;  %642 = vst.msk [vmem:[#allocation3 + $0x28] sm:$0xff] %vm636_vm8, %v617_v20 }
 0x102   : > { %582 = vst.msk [vmem:[#allocation3 + $0x30] sm:$0xff] %vm575_vm7, %v558_v21 }
 0x104   : > { %v320_v22 = vpop.permute.xlu1 %319 }
 0x105   : > { %v676_v23 = vpop.permute.xlu0 %675  ;;  %341 = vst.msk [vmem:[#allocation3 + $0x48] sm:$0xff] %vm331_vm3, %v320_v22 }
 0x106   : > { %702 = vst.msk [vmem:[#allocation3 + $0x20] sm:$0xff] %vm697_vm9, %v676_v23 }
 0x108   : > { %v560_v24 = vpop.permute.xlu1 %559 }
 0x109   : > { %v379_v25 = vpop.permute.xlu0 %378  ;;  %583 = vst.msk [vmem:[#allocation3 + $0x38] sm:$0xff] %vm575_vm7, %v560_v24 }
 0x10a   : > { %401 = vst.msk [vmem:[#allocation3 + $0x40] sm:$0xff] %vm392_vm4, %v379_v25 }
 0x10c   : > { %v678_v26 = vpop.permute.xlu1 %677 }
 0x10d   : > { %v619_v27 = vpop.permute.xlu0 %618  ;;  %703 = vst.msk [vmem:[#allocation3 + $0x28] sm:$0xff] %vm697_vm9, %v678_v26 }
 0x10e   : > { %643 = vst.msk [vmem:[#allocation3 + $0x30] sm:$0xff] %vm636_vm8, %v619_v27 }
 0x110   : > { %v381_v28 = vpop.permute.xlu1 %380 }
 0x111   : > { %v737_v29 = vpop.permute.xlu0 %736  ;;  %402 = vst.msk [vmem:[#allocation3 + $0x48] sm:$0xff] %vm392_vm4, %v381_v28 }
 0x112   : > { %763 = vst.msk [vmem:[#allocation3 + $0x20] sm:$0xff] %vm758_vm10, %v737_v29 }
 0x114   : > { %v621_v30 = vpop.permute.xlu1 %620 }
 0x115   : > { %v440_v31 = vpop.permute.xlu0 %439  ;;  %644 = vst.msk [vmem:[#allocation3 + $0x38] sm:$0xff] %vm636_vm8, %v621_v30 }
 0x116   : > { %462 = vst.msk [vmem:[#allocation3 + $0x40] sm:$0xff] %vm453_vm5, %v440_v31 }
 0x118   : > { %v739_v32 = vpop.permute.xlu1 %738 }
 0x119   : > { %v680_v33 = vpop.permute.xlu0 %679  ;;  %v773_v34 = vld [vmem:[#allocation3 + $0x20] sm:$0xff]  ;;  %764 = vst.msk [vmem:[#allocation3 + $0x28] sm:$0xff] %vm758_vm10, %v739_v32 }
 0x11a   : > { %704 = vst.msk [vmem:[#allocation3 + $0x30] sm:$0xff] %vm697_vm9, %v680_v33  ;;  %1422 = vmatprep.mubr.msk.f32.mxu0 %vm784_vm11, %v773_v34 }
 0x11c   : > { %v501_v36 = vpop.permute.xlu1 %500 }
 0x11d   : > { %v442_v35 = vpop.permute.xlu0 %441  ;;  %523 = vst.msk [vmem:[#allocation3 + $0x40] sm:$0xff] %vm514_vm6, %v501_v36 }
 0x11e   : > { %463 = vst.msk [vmem:[#allocation3 + $0x48] sm:$0xff] %vm453_vm5, %v442_v35 }
 0x120   : > { %v741_v38 = vpop.permute.xlu1 %740  ;;  %v774_v39 = vld [vmem:[#allocation3 + $0x28] sm:$0xff] }
 0x121   : > { %v682_v37 = vpop.permute.xlu0 %681  ;;  %765 = vst.msk [vmem:[#allocation3 + $0x30] sm:$0xff] %vm758_vm10, %v741_v38  ;;  %1423 = vmatmul.mubr.msk.f32.gmra.mrb[4].mxu0 %vm784_vm11, %v774_v39 }
 0x122   : > { %705 = vst.msk [vmem:[#allocation3 + $0x38] sm:$0xff] %vm697_vm9, %v682_v37 }
 0x124   : > { %v562_v41 = vpop.permute.xlu1 %561 }
 0x125   : > { %v503_v40 = vpop.permute.xlu0 %502  ;;  %584 = vst.msk [vmem:[#allocation3 + $0x40] sm:$0xff] %vm575_vm7, %v562_v41 }
 0x126   : > { %524 = vst.msk [vmem:[#allocation3 + $0x48] sm:$0xff] %vm514_vm6, %v503_v40 }
 0x128   : > { %v564_v43 = vpop.permute.xlu1 %563  ;;  %v775_v44 = vld [vmem:[#allocation3 + $0x30] sm:$0xff] }
 0x129   : > { %v743_v42 = vpop.permute.xlu0 %742  ;;  %585 = vst.msk [vmem:[#allocation3 + $0x48] sm:$0xff] %vm575_vm7, %v564_v43  ;;  %1425 = vmatprep.mubr.msk.f32.mxu1 %vm784_vm11, %v775_v44 }
 0x12a   : > { %766 = vst.msk [vmem:[#allocation3 + $0x38] sm:$0xff] %vm758_vm10, %v743_v42 }
 0x12c   : > { %v625_v46 = vpop.permute.xlu1 %624 }
 0x12d   : > { %v623_v45 = vpop.permute.xlu0 %622  ;;  %646 = vst.msk [vmem:[#allocation3 + $0x48] sm:$0xff] %vm636_vm8, %v625_v46 }
 0x12e   : > { %645 = vst.msk [vmem:[#allocation3 + $0x40] sm:$0xff] %vm636_vm8, %v623_v45 }
 0x130   : > { %v686_v48 = vpop.permute.xlu1 %685 }
 0x131   : > { %v684_v47 = vpop.permute.xlu0 %683  ;;  %v776_v49 = vld [vmem:[#allocation3 + $0x38] sm:$0xff]  ;;  %707 = vst.msk [vmem:[#allocation3 + $0x48] sm:$0xff] %vm697_vm9, %v686_v48 }
 0x132   : > { %706 = vst.msk [vmem:[#allocation3 + $0x40] sm:$0xff] %vm697_vm9, %v684_v47  ;;  %1426 = vmatmul.mubr.msk.f32.vlgmr.msra.gmra.mrb[0].mxu1 %vm784_vm11, %v776_v49 }
 0x134   : > { %v747_v51 = vpop.permute.xlu1 %746 }
 0x135   : > { %v745_v50 = vpop.permute.xlu0 %744  ;;  %768 = vst.msk [vmem:[#allocation3 + $0x48] sm:$0xff] %vm758_vm10, %v747_v51 }
 0x136   : > { %767 = vst.msk [vmem:[#allocation3 + $0x40] sm:$0xff] %vm758_vm10, %v745_v50 }
 0x13c   : > { %v778_v53 = vld [vmem:[#allocation3 + $0x48] sm:$0xff] }
 0x13d   : > { %v777_v52 = vld [vmem:[#allocation3 + $0x40] sm:$0xff] }
 0x13e   : > { %1428 = vmatprep.mubr.msk.f32.mxu1 %vm784_vm11, %v777_v52 }
 0x13f   : > { %1429 = vmatmul.mubr.msk.f32.gmra.mrb[2].mxu1 %vm784_vm11, %v778_v53 }
 0x1a4   : > { %v1418_v54 = vpop.f32.mrb[0].mxu0 }
 0x1a5   : > { %935 = vst [vmem:[%s1987_s11 + $0x7] sm:$0x1] %v1418_v54  ;;  %v940_v55 = vrot.slane %v1418_v54, 1  ;;  %v951_v56 = vmul.f32 %v1418_v54, %v1418_v54  ;;  %1369 = vst [vmem:[%s1987_s11 + $0x5] sm:$0xf8] %v1418_v54  ;;  %v885_v57 = vpop.f32.mrb[1].mxu0 }
 0x1a6   : > { %934 = vst [vmem:[%s1987_s11 - $0x1] sm:$0xfe] %v885_v57  ;;  %v939_v58 = vrot.slane %v885_v57, 1  ;;  %v950_v59 = vmul.f32 %v885_v57, %v885_v57  ;;  %v970_v5 = vrot.slane %v1418_v54, 3 }
 0x1a7   : > { %v955_v60 = vrot.slane %v951_v56, 1  ;;  %v983_v13 = vrot.slane %v951_v56, 3 }
 0x1a8   : > { %v941_v61 = vsel %vm938_vm12, %v939_v58, %v940_v55  ;;  %v954_v62 = vrot.slane %v950_v59, 1 }
 0x1a9   : > { %v943_v0 = vrot.slane %v941_v61, 4 }
 0x1aa   : > { %v956_v63 = vsel %vm938_vm12, %v954_v62, %v955_v60 }
 0x1ab   : > { %v958_v1 = vrot.slane %v956_v63, 4  ;;  %v944_v2 = vadd.f32 %v943_v0, %v941_v61 }
 0x1ad   : > { %v959_v3 = vadd.f32 %v958_v1, %v956_v63  ;;  %v945_v9 = vrot.slane %v944_v2, 2 }
 0x1af   : > { %v960_v14 = vrot.slane %v959_v3, 2  ;;  %v946_v22 = vadd.f32 %v945_v9, %v944_v2 }
 0x1b1   : > { %v961_v29 = vadd.f32 %v960_v14, %v959_v3  ;;  %v947_v34 = vrot.slane %v946_v22, 1 }
 0x1b3   : > { %v962_v39 = vrot.slane %v961_v29, 1  ;;  %v948_v44 = vadd.f32 %v947_v34, %v946_v22 }
 0x1b5   : > { %v963_v48 = vadd.f32 %v962_v39, %v961_v29 }
 0x1cc   : > { %v1994_v4 = vpop.f32.mrb[2].mxu0 }
 0x1cd   : > { %1372 = vst [vmem:[%s1987_s11 + $0x13] sm:$0x1f] %v1994_v4  ;;  %v1000_v6 = vrot.slane %v1994_v4, 5  ;;  %v2001_v7 = vmul.f32 %v1994_v4, %v1994_v4  ;;  %1373 = vst [vmem:[%s1987_s11 + $0x11] sm:$0x80] %v1994_v4  ;;  %v895_v8 = vpop.f32.mrb[3].mxu0 }
 0x1ce   : > { %1370 = vst [vmem:[%s1987_s11 + $0xd] sm:$0x7] %v895_v8  ;;  %v971_v10 = vrot.slane %v895_v8, 3  ;;  %v981_v11 = vmul.f32 %v895_v8, %v895_v8  ;;  %1371 = vst [vmem:[%s1987_s11 + $0xb] sm:$0xe0] %v895_v8  ;;  %v999_v12 = vrot.slane %v895_v8, 5 }
 0x1cf   : > { %v1013_v15 = vrot.slane %v2001_v7, 5  ;;  %v1028_v58 = vrot.slane %v1994_v4, 7  ;;  %v1041_v61 = vrot.slane %v2001_v7, 7 }
 0x1d0   : > { %v972_v16 = vsel %vm969_vm13, %v970_v5, %v971_v10  ;;  %v984_v17 = vrot.slane %v981_v11, 3  ;;  %v1001_v18 = vsel %vm998_vm14, %v999_v12, %v1000_v6  ;;  %v1012_v19 = vrot.slane %v981_v11, 5 }
 0x1d1   : > { %v974_v20 = vrot.slane %v972_v16, 4  ;;  %v1003_v21 = vrot.slane %v1001_v18, 4 }
 0x1d2   : > { %v985_v23 = vsel %vm969_vm13, %v983_v13, %v984_v17  ;;  %v1014_v24 = vsel %vm998_vm14, %v1012_v19, %v1013_v15 }
 0x1d3   : > { %v975_v25 = vadd.f32 %v974_v20, %v972_v16  ;;  %v987_v26 = vrot.slane %v985_v23, 4  ;;  %v1004_v27 = vadd.f32 %v1003_v21, %v1001_v18  ;;  %v1016_v28 = vrot.slane %v1014_v24, 4 }
 0x1d5   : > { %v976_v30 = vrot.slane %v975_v25, 2  ;;  %v988_v31 = vadd.f32 %v987_v26, %v985_v23  ;;  %v1005_v32 = vrot.slane %v1004_v27, 2  ;;  %v1017_v33 = vadd.f32 %v1016_v28, %v1014_v24 }
 0x1d7   : > { %v977_v35 = vadd.f32 %v976_v30, %v975_v25  ;;  %v989_v36 = vrot.slane %v988_v31, 2  ;;  %v1006_v37 = vadd.f32 %v1005_v32, %v1004_v27  ;;  %v1018_v38 = vrot.slane %v1017_v33, 2 }
 0x1d9   : > { %v978_v40 = vrot.slane %v977_v35, 1  ;;  %v990_v41 = vadd.f32 %v989_v36, %v988_v31  ;;  %v1007_v42 = vrot.slane %v1006_v37, 1  ;;  %v1019_v43 = vadd.f32 %v1018_v38, %v1017_v33 }
 0x1db   : > { %v979_v45 = vadd.f32 %v978_v40, %v977_v35  ;;  %v991_v46 = vrot.slane %v990_v41, 1  ;;  %v1020_v47 = vrot.slane %v1019_v43, 1  ;;  %v1008_v51 = vadd.f32 %v1007_v42, %v1006_v37 }
 0x1dd   : > { %v980_v49 = vadd.f32 %v979_v45, %v948_v44  ;;  %v992_v50 = vadd.f32 %v991_v46, %v990_v41  ;;  %v1021_v54 = vadd.f32 %v1020_v47, %v1019_v43 }
 0x1df   : > { %v993_v52 = vadd.f32 %v992_v50, %v963_v48  ;;  %v1009_v53 = vadd.f32 %v1008_v51, %v980_v49 }
 0x1e1   : > { %v1022_v55 = vadd.f32 %v1021_v54, %v993_v52 }
 0x1f4   : > { %v1424_v56 = vpop.f32.mrb[4].mxu0 }
 0x1f5   : > { %1375 = vst [vmem:[%s1987_s11 + $0x1f] sm:$0xfe] %v1424_v56  ;;  %v905_v57 = vpop.f32.mrb[5].mxu0  ;;  %v1068_v11 = vmul.f32 %v1424_v56, %v1424_v56  ;;  %v1057_v19 = vrot.slane %v1424_v56, 1 }
 0x1f6   : > { %1374 = vst [vmem:[%s1987_s11 + $0x19] sm:$0x7f] %v905_v57  ;;  %v1029_v59 = vrot.slane %v905_v57, 7  ;;  %v1039_v60 = vmul.f32 %v905_v57, %v905_v57 }
 0x1f7   : > { %v1072_v23 = vrot.slane %v1068_v11, 1 }
 0x1f8   : > { %v1030_v62 = vsel %vm1027_vm15, %v1028_v58, %v1029_v59  ;;  %v1042_v63 = vrot.slane %v1039_v60, 7 }
 0x1f9   : > { %v1032_v0 = vrot.slane %v1030_v62, 4 }
 0x1fa   : > { %v1043_v1 = vsel %vm1027_vm15, %v1041_v61, %v1042_v63 }
 0x1fb   : > { %v1033_v2 = vadd.f32 %v1032_v0, %v1030_v62  ;;  %v1045_v3 = vrot.slane %v1043_v1, 4 }
 0x1fd   : > { %v1034_v5 = vrot.slane %v1033_v2, 2  ;;  %v1046_v6 = vadd.f32 %v1045_v3, %v1043_v1 }
 0x1ff   : > { %v1035_v8 = vadd.f32 %v1034_v5, %v1033_v2  ;;  %v1047_v4 = vrot.slane %v1046_v6, 2 }
 0x201   : > { %v1036_v9 = vrot.slane %v1035_v8, 1  ;;  %v1048_v10 = vadd.f32 %v1047_v4, %v1046_v6 }
 0x203   : > { %v1037_v7 = vadd.f32 %v1036_v9, %v1035_v8  ;;  %v1049_v12 = vrot.slane %v1048_v10, 1 }
 0x205   : > { %v2018_v13 = vpop.f32.mrb[0].mxu1  ;;  %v2020_v14 = vadd.f32 %v1037_v7, %v1009_v53  ;;  %v1050_v15 = vadd.f32 %v1049_v12, %v1048_v10 }
 0x206   : > { %1378 = vst [vmem:[%s1987_s11 + $0x2d] sm:$0x7] %v2018_v13  ;;  %v1088_v16 = vrot.slane %v2018_v13, 3  ;;  %v2027_v17 = vmul.f32 %v2018_v13, %v2018_v13  ;;  %1379 = vst [vmem:[%s1987_s11 + $0x2b] sm:$0xe0] %v2018_v13  ;;  %v915_v18 = vpop.f32.mrb[1].mxu1 }
 0x207   : > { %1376 = vst [vmem:[%s1987_s11 + $0x27] sm:$0x1] %v915_v18  ;;  %v1058_v20 = vrot.slane %v915_v18, 1  ;;  %v1069_v21 = vmul.f32 %v915_v18, %v915_v18  ;;  %1377 = vst [vmem:[%s1987_s11 + $0x25] sm:$0xf8] %v915_v18  ;;  %v1087_v22 = vrot.slane %v915_v18, 3  ;;  %v2033_v24 = vadd.f32 %v1050_v15, %v1022_v55 }
 0x208   : > { %v1101_v25 = vrot.slane %v2027_v17, 3  ;;  %v1115_v50 = vrot.slane %v2018_v13, 5  ;;  %v1128_v59 = vrot.slane %v2027_v17, 5 }
 0x209   : > { %v1059_v26 = vsel %vm938_vm12, %v1057_v19, %v1058_v20  ;;  %v1073_v27 = vrot.slane %v1069_v21, 1  ;;  %v1089_v28 = vsel %vm969_vm13, %v1087_v22, %v1088_v16  ;;  %v1100_v29 = vrot.slane %v1069_v21, 3 }
 0x20a   : > { %v1061_v30 = vrot.slane %v1059_v26, 4  ;;  %v1091_v31 = vrot.slane %v1089_v28, 4 }
 0x20b   : > { %v1074_v32 = vsel %vm938_vm12, %v1072_v23, %v1073_v27  ;;  %v1102_v33 = vsel %vm969_vm13, %v1100_v29, %v1101_v25 }
 0x20c   : > { %v1062_v34 = vadd.f32 %v1061_v30, %v1059_v26  ;;  %v1076_v35 = vrot.slane %v1074_v32, 4  ;;  %v1092_v36 = vadd.f32 %v1091_v31, %v1089_v28  ;;  %v1104_v37 = vrot.slane %v1102_v33, 4 }
 0x20e   : > { %v1063_v38 = vrot.slane %v1062_v34, 2  ;;  %v1077_v39 = vadd.f32 %v1076_v35, %v1074_v32  ;;  %v1105_v40 = vadd.f32 %v1104_v37, %v1102_v33  ;;  %v1093_v41 = vrot.slane %v1092_v36, 2 }
 0x210   : > { %v1078_v42 = vrot.slane %v1077_v39, 2  ;;  %v1064_v43 = vadd.f32 %v1063_v38, %v1062_v34  ;;  %v2042_v44 = vadd.f32 %v1093_v41, %v1092_v36  ;;  %v1106_v45 = vrot.slane %v1105_v40, 2 }
 0x212   : > { %v1430_v46 = vpop.f32.mrb[2].mxu1  ;;  %v1065_v47 = vrot.slane %v1064_v43, 1  ;;  %v1079_v48 = vadd.f32 %v1078_v42, %v1077_v39  ;;  %v1107_v49 = vadd.f32 %v1106_v45, %v1105_v40  ;;  %v1095_v54 = vrot.slane %v2042_v44, 1 }
 0x213   : > { %1382 = vst [vmem:[%s1987_s11 + $0x39] sm:$0x7f] %v1430_v46  ;;  %v1144_v51 = vrot.slane %v1430_v46, 7  ;;  %v1154_v52 = vmul.f32 %v1430_v46, %v1430_v46  ;;  %v925_v53 = vpop.f32.mrb[3].mxu1 }
 0x214   : > { %1380 = vst [vmem:[%s1987_s11 + $0x33] sm:$0x1f] %v925_v53  ;;  %v1116_v55 = vrot.slane %v925_v53, 5  ;;  %v1126_v56 = vmul.f32 %v925_v53, %v925_v53  ;;  %1381 = vst [vmem:[%s1987_s11 + $0x31] sm:$0x80] %v925_v53  ;;  %v1143_v57 = vrot.slane %v925_v53, 7  ;;  %v1066_v58 = vadd.f32 %v1065_v47, %v1064_v43 }
 0x215   : > { %v1157_v60 = vrot.slane %v1154_v52, 7 }
 0x216   : > { %1533 = shalt.err (!%p1530_p5)
}
 0x217   : > { %s1534_s10 = scalar_lea.hbm %s2047_s6, 1024  ;;  %s1538_s30 = scalar_lea.hbm %s2187_s2, 2048 }
 0x218   : > { %p1535_p6 = scmp.ne.s32.totalorder %s2047_s6, %s1534_s10  ;;  %p1539_p10 = scmp.lt.u32.totalorder %s2047_s6, %s2187_s2 }
 0x219   : > { %p1540_p11 = scmp.lt.u32.totalorder %s1538_s30, %s1534_s10  ;;  %p1542_p13 = scmp.lt.u32.totalorder %s1534_s10, %s2047_s6 }
 0x21a   : > { %p1536_p7 = pnand %p1535_p6, %p1739_p4 }
 0x21b   : > { %p1541_p12 = por %p1540_p11, %p1539_p10 }
 0x21c   : > { %p1537_p9 = pneg %p1536_p7 }
 0x21d   : > { %p1543_p0 = por %p1542_p13, %p1541_p12 }
 0x21f   : > { %p1544_p1 = pnand %p1543_p0, %p1537_p9 }
 0x221   : > { %1547 = shalt.err (!%p1544_p1)
}
 0x222   : > { %s1669_s14 = smov 128   ;;  %v1080_v61 = vrot.slane %v1079_v48, 1  ;;  %v1108_v62 = vrot.slane %v1107_v49, 1  ;;  %v1117_v63 = vsel %vm998_vm14, %v1115_v50, %v1116_v55  ;;  %v1129_v0 = vrot.slane %v1126_v56, 5  ;;  %s224_s26 = scalar_lea.vmem [#allocation8], %s1984_s9 }
 0x223   : > { %1446 = dma.vmem_to_hbm [thread:$0]  (%p1739_p4), %s2049_s13, 1024, %s2047_s6, %s1170_s7, %s1669_s14, %s1669_s14, %s1660_s8   ;;  %v1145_v1 = vsel %vm1027_vm15, %v1143_v57, %v1144_v51  ;;  %v1156_v2 = vrot.slane %v1126_v56, 7  ;;  %v1119_v3 = vrot.slane %v1117_v63, 4  ;;  %v1067_v6 = vadd.f32 %v1066_v58, %v2020_v14 }
 0x224   : > { %v1147_v5 = vrot.slane %v1145_v1, 4  ;;  %v1081_v8 = vadd.f32 %v1080_v61, %v1079_v48  ;;  %v1130_v4 = vsel %vm998_vm14, %v1128_v59, %v1129_v0  ;;  %v1096_v10 = vadd.f32 %v1095_v54, %v2042_v44  ;;  %s2091_s8 = sand.u32 1, %s1351_s21   ;;  %s1386_s13 = sshll.u32 %s1650_s18, 4 }
 0x225   : > { %v1158_v9 = vsel %vm1027_vm15, %v1156_v2, %v1157_v60  ;;  %v1120_v11 = vadd.f32 %v1119_v3, %v1117_v63  ;;  %v1132_v7 = vrot.slane %v1130_v4, 4  ;;  %v1109_v17 = vadd.f32 %v1108_v62, %v1107_v49  ;;  %s218_s6 = scalar_lea.vmem [#allocation6], %s1984_s9  ;;  %s1224_s29 = sshll.u32 %s224_s26, 4  ;;  %s2110_s29 = int_to_ptr.vmem [resolvable:$true] %s1224_s29 }
 0x226   : > { %v1148_v12 = vadd.f32 %v1147_v5, %v1145_v1  ;;  %v1160_v13 = vrot.slane %v1158_v9, 4  ;;  %v1097_v15 = vadd.f32 %v1096_v10, %v1067_v6  ;;  %v1082_v16 = vadd.f32 %v1081_v8, %v2033_v24  ;;  %s1210_s7 = sshll.u32 %s218_s6, 4  ;;  %s2101_s12 = scalar_lea.hbm %s2188_s3, %s1386_s13  ;;  %s2103_s7 = int_to_ptr.vmem [resolvable:$true] %s1210_s7 }
 0x227   : > { %v1121_v18 = vrot.slane %v1120_v11, 2  ;;  %v1133_v19 = vadd.f32 %v1132_v7, %v1130_v4  ;;  %s2108_s30 = scalar_lea.hbm %s2189_s4, %s1386_s13  ;;  %s1175_s5 = scalar_lea.sflag [#allocation7], %s2091_s8 }
 0x228   : > { %v1161_v14 = vadd.f32 %v1160_v13, %v1158_v9  ;;  %v1149_v20 = vrot.slane %v1148_v12, 2  ;;  %v1110_v21 = vadd.f32 %v1109_v17, %v1082_v16  ;;  %s1548_s24 = scalar_lea.vmem %s2103_s7, 16  ;;  %s1670_s14 = smov [#allocation6]  }
 0x229   : > { %v1134_v22 = vrot.slane %v1133_v19, 2  ;;  %v1122_v23 = vadd.f32 %v1121_v18, %v1120_v11  ;;  %p1549_p2 = scmp.ne.s32.totalorder %s2103_s7, %s1548_s24  ;;  %s1552_s10 = sshll.u32 %s1670_s14, 4  ;;  %s1553_s10 = int_to_ptr.vmem [resolvable:$false] %s1552_s10 }
 0x22a   : > { %v1150_v25 = vadd.f32 %v1149_v20, %v1148_v12  ;;  %v1162_v26 = vrot.slane %v1161_v14, 2  ;;  %s1554_s11 = scalar_lea.vmem %s1553_s10, 32  ;;  %p1555_p6 = scmp.lt.s32.totalorder %s2103_s7, %s1553_s10 }
 0x22b   : > { %v1123_v27 = vrot.slane %v1122_v23, 1  ;;  %v1135_v29 = vadd.f32 %v1134_v22, %v1133_v19  ;;  %p1550_p3 = pnand %p1549_p2, %p1739_p4  ;;  %p1556_p7 = scmp.lt.s32.totalorder %s1554_s11, %s1548_s24 }
 0x22c   : > { %v1151_v28 = vrot.slane %v1150_v25, 1  ;;  %v1163_v30 = vadd.f32 %v1162_v26, %v1161_v14 }
 0x22d   : > { %v1124_v24 = vadd.f32 %v1123_v27, %v1122_v23  ;;  %v1136_v31 = vrot.slane %v1135_v29, 1  ;;  %p1551_p5 = pneg %p1550_p3  ;;  %p1557_p9 = por %p1556_p7, %p1555_p6 }
 0x22e   : > { %v1164_v32 = vrot.slane %v1163_v30, 1  ;;  %v1152_v34 = vadd.f32 %v1151_v28, %v1150_v25 }
 0x22f   : > { %v1125_v33 = vadd.f32 %v1124_v24, %v1097_v15  ;;  %v1137_v35 = vadd.f32 %v1136_v31, %v1135_v29  ;;  %p1558_p10 = pnand %p1557_p9, %p1551_p5 }
 0x230   : > { %v1165_v38 = vadd.f32 %v1164_v32, %v1163_v30 }
 0x231   : > { %v1153_v36 = vadd.f32 %v1152_v34, %v1125_v33  ;;  %v1138_v37 = vadd.f32 %v1137_v35, %v1110_v21 }
 0x233   : > { %1167 = vst [vmem:[%s218_s6] sm:$0x1] %v1153_v36  ;;  %v1166_v39 = vadd.f32 %v1165_v38, %v1138_v37 }
 0x234   : > { %1561 = shalt.err (!%p1558_p10)
}
 0x235   : > { %s1562_s13 = scalar_lea.hbm %s2101_s12, 16  ;;  %s1566_s21 = scalar_lea.hbm %s2188_s3, 32 }
 0x236   : > { %p1563_p11 = scmp.ne.s32.totalorder %s2101_s12, %s1562_s13  ;;  %p1567_p0 = scmp.lt.u32.totalorder %s2101_s12, %s2188_s3 }
 0x237   : > { %p1568_p1 = scmp.lt.u32.totalorder %s1566_s21, %s1562_s13  ;;  %p1570_p3 = scmp.lt.u32.totalorder %s1562_s13, %s2101_s12 }
 0x238   : > { %p1564_p12 = pnand %p1563_p11, %p1739_p4 }
 0x239   : > { %p1569_p2 = por %p1568_p1, %p1567_p0 }
 0x23a   : > { %p1565_p13 = pneg %p1564_p12 }
 0x23b   : > { %p1571_p5 = por %p1570_p3, %p1569_p2 }
 0x23d   : > { %p1572_p6 = pnand %p1571_p5, %p1565_p13 }
 0x23f   : > { %1575 = shalt.err (!%p1572_p6)
}
 0x240   : > { %1447 = dma.vmem_to_hbm [thread:$0]  (%p1739_p4), %s2103_s7, 16, %s2101_s12, %s1175_s5   ;;  %1168 = vst [vmem:[%s224_s26] sm:$0x1] %v1166_v39 }
 0x241   : > { %s1576_s24 = scalar_lea.vmem %s2110_s29, 16  ;;  %s1671_s11 = smov [#allocation8]  }
 0x242   : > { %p1577_p7 = scmp.ne.s32.totalorder %s2110_s29, %s1576_s24  ;;  %s1580_s13 = sshll.u32 %s1671_s11, 4  ;;  %s1581_s13 = int_to_ptr.vmem [resolvable:$false] %s1580_s13 }
 0x243   : > { %s1582_s6 = scalar_lea.vmem %s1581_s13, 32  ;;  %p1583_p11 = scmp.lt.s32.totalorder %s2110_s29, %s1581_s13 }
 0x244   : > { %p1578_p9 = pnand %p1577_p7, %p1739_p4  ;;  %p1584_p12 = scmp.lt.s32.totalorder %s1582_s6, %s1576_s24 }
 0x246   : > { %p1579_p10 = pneg %p1578_p9  ;;  %p1585_p13 = por %p1584_p12, %p1583_p11 }
 0x248   : > { %p1586_p0 = pnand %p1585_p13, %p1579_p10 }
 0x24a   : > { %1589 = shalt.err (!%p1586_p0)
}
 0x24b   : > { %s1590_s9 = scalar_lea.hbm %s2108_s30, 16  ;;  %s1594_s12 = scalar_lea.hbm %s2189_s4, 32 }
 0x24c   : > { %p1591_p1 = scmp.ne.s32.totalorder %s2108_s30, %s1590_s9  ;;  %p1595_p5 = scmp.lt.u32.totalorder %s2108_s30, %s2189_s4 }
 0x24d   : > { %p1596_p6 = scmp.lt.u32.totalorder %s1594_s12, %s1590_s9  ;;  %p1598_p9 = scmp.lt.u32.totalorder %s1590_s9, %s2108_s30 }
 0x24e   : > { %p1592_p2 = pnand %p1591_p1, %p1739_p4 }
 0x24f   : > { %p1597_p7 = por %p1596_p6, %p1595_p5 }
 0x250   : > { %p1593_p3 = pneg %p1592_p2 }
 0x251   : > { %p1599_p10 = por %p1598_p9, %p1597_p7 }
 0x253   : > { %p1600_p11 = pnand %p1599_p10, %p1593_p3 }
 0x255   : > { %1603 = shalt.err (!%p1600_p11)
}
 0x256   : > { %1448 = dma.vmem_to_hbm [thread:$0]  (%p1739_p4), %s2110_s29, 16, %s2108_s30, %s1175_s5  }
 0x257 PF: > { %p1462_p12 = scmp.ge.s32.totalorder %s1658_s20, 2  ;;  %s1236_s14 = sand.u32 1, %s1638_s15  }
 0x258   : > { %s1237_s10 = scalar_lea.sflag [#allocation5], %s1236_s14 }
 0x259   : > { %p1453_p13 = pnand %p1462_p12, %p1748_p8 }
 0x25b   : > { %1629 = dma.done.wait (!%p1453_p13), %s1237_s10, 1024  }
 0x25c   : > { %1631 = vsyncadd (!%p1453_p13), %s1237_s10, 4294966272  ;;  %s1245_s24 = sand.u32 1, %s1352_s22  }
 0x25d   : > { %s1246_s25 = scalar_lea.sflag [#allocation7], %s1245_s24 }
 0x25e   : > { %1633 = dma.done.wait (!%p1453_p13), %s1246_s25, 32  }
 0x25f   : > { %1635 = vsyncadd (!%p1453_p13), %s1246_s25, 4294967264  ;;  %s21_s20 = sadd.s32 1, %s1658_s20   ;;  %s2192_s15 = smov %s1642_s16 }
 0x260   : > { %p18_p4 = scmp.ge.s32.totalorder %s21_s20, 4   ;;  %s2193_s16 = smov %s1646_s17 }
 0x261   : > { %s2194_s17 = smov %s1754_s28  ;;  %s2195_s18 = smov %s1654_s19 }
 0x262   : > { %s2196_s19 = smov %s2198_s23  ;;  %20 = sbr.rel (!%p18_p4) target bundleno = 6 (0x6), region = 103 }
 0x269   :  { %1258 = vsyncpa [#allocation5], 1 }
 0x26a   :  { %1260 = vsyncpa [#allocation5 + $0x1], 1 }
 0x26b   :  { %1261 = vsyncpa [#allocation7], 1 }
 0x26c   :  { %1263 = vsyncpa [#allocation7 + $0x1], 1 }

</bundles_post_ra>
